<compile_context>
chip_gen: v7x
topology: tpu7x:2x2x1
jax: 0.10.0
libtpu: 0.0.40
codegen_flags: <defaults>
</compile_context>

<pallas_src>
import functools

import jax
import jax.numpy as jnp
from jax.experimental import pallas as pl
from jax.experimental.pallas import tpu as pltpu

C = 448       # 7 * m, m = 16 (channel width entering BatchNormReLU / Linear)
C_PAD = 512   # padded to 4 * 128 lanes == 2 * 256 MXU tiles


def _bn_relu_linear_kernel(x_ref, scale_ref, shift_ref, w_ref, b_ref, o_ref):
    """Fused BatchNormReLU + Linear over one tile of points.

    x_ref     : (TILE_N, C_PAD)  f32   point features (sparse backbone output)
    scale_ref : (1, C_PAD)       f32   folded BN scale  = gamma / sqrt(var + eps)
    shift_ref : (1, C_PAD)       f32   folded BN shift  = beta - mean * scale
    w_ref     : (C_PAD, C_PAD)   bf16  linear weight, (in, out), zero-padded
    b_ref     : (1, C_PAD)       f32   linear bias, zero-padded
    o_ref     : (TILE_N, C_PAD)  f32   output
    """
    x = x_ref[...]
    # BN + ReLU in f32 on the VPU (hidden under MXU slack; v5e has no bf16 VPU).
    h = jnp.maximum(x * scale_ref[...] + shift_ref[...], 0.0)
    # bf16 MXU matmul with f32 accumulation.
    o_ref[...] = (
        jnp.dot(h.astype(jnp.bfloat16), w_ref[...],
                preferred_element_type=jnp.float32)
        + b_ref[...]
    ).astype(o_ref.dtype)


def _pick_tile(n):
    """Largest of {512, 256, 128} rows that still leaves >= 2 grid steps."""
    for t in (512, 256, 128):
        if pl.cdiv(n, t) >= 2:
            return t
    return 128  # tiny point count: single 128-row tile


@functools.partial(jax.jit, static_argnames=("tile_n",))
def _dense_head_padded(x_pad, scale_pad, shift_pad, w_pad_bf16, b_pad, *, tile_n):
    n_pad = x_pad.shape[0]
    grid = (n_pad // tile_n,)

    flops = 2 * n_pad * C_PAD * C_PAD
    bytes_accessed = (n_pad * C_PAD * 4        # x read (f32)
                      + n_pad * C_PAD * 4      # y write (f32)
                      + C_PAD * C_PAD * 2)     # resident bf16 weight

    return pl.pallas_call(
        _bn_relu_linear_kernel,
        out_shape=jax.ShapeDtypeStruct((n_pad, C_PAD), jnp.float32),
        grid_spec=pltpu.PrefetchScalarGridSpec(
            num_scalar_prefetch=0,
            grid=grid,
            in_specs=[
                pl.BlockSpec((tile_n, C_PAD), lambda i: (i, 0)),   # x tile
                pl.BlockSpec((1, C_PAD), lambda i: (0, 0)),        # bn scale
                pl.BlockSpec((1, C_PAD), lambda i: (0, 0)),        # bn shift
                pl.BlockSpec((C_PAD, C_PAD), lambda i: (0, 0)),    # weight (in, out), resident
                pl.BlockSpec((1, C_PAD), lambda i: (0, 0)),        # bias
            ],
            out_specs=pl.BlockSpec((tile_n, C_PAD), lambda i: (i, 0)),
        ),
        compiler_params=pltpu.CompilerParams(
            dimension_semantics=("parallel",),
        ),
        cost_estimate=pl.CostEstimate(
            flops=flops, transcendentals=0, bytes_accessed=bytes_accessed),
    )(x_pad, scale_pad, shift_pad, w_pad_bf16, b_pad)


def unet_dense_head(x, bn_scale, bn_shift, w_t, b):
    """x: (N, 448) f32 point features -> (N, 448) f32.

    y = relu(x * bn_scale + bn_shift) @ w_t + b
    """
    n = x.shape[0]
    tile_n = _pick_tile(n)
    n_pad = pl.cdiv(n, tile_n) * tile_n

    # Zero-pad channels 448 -> 512 and rows N -> n_pad.  Zero scale/shift,
    # zero weight rows/cols and zero bias make the extra channels numerically
    # inert; padded rows produce garbage but are sliced off below (so no
    # downstream reduction ever sees them).
    x_pad = jnp.zeros((n_pad, C_PAD), jnp.float32).at[:n, :C].set(x)
    scale_pad = jnp.zeros((1, C_PAD), jnp.float32).at[:, :C].set(bn_scale.reshape(1, C))
    shift_pad = jnp.zeros((1, C_PAD), jnp.float32).at[:, :C].set(bn_shift.reshape(1, C))
    w_pad = jnp.zeros((C_PAD, C_PAD), jnp.bfloat16).at[:C, :C].set(w_t.astype(jnp.bfloat16))
    b_pad = jnp.zeros((1, C_PAD), jnp.float32).at[:, :C].set(b.reshape(1, C))

    y_pad = _dense_head_padded(x_pad, scale_pad, shift_pad, w_pad, b_pad,
                               tile_n=tile_n)
    return y_pad[:n, :C]


def _reference(x, bn_scale, bn_shift, w_t, b):
    h = jnp.maximum(x * bn_scale.reshape(1, C) + bn_shift.reshape(1, C), 0.0)
    return h @ w_t + b.reshape(1, C)


if __name__ == "__main__":
    key = jax.random.PRNGKey(0)
    k_x, k_gamma, k_beta, k_mean, k_var, k_w, k_b = jax.random.split(key, 7)

    # Small synthetic "active point" count standing in for the sparse voxel set.
    N = 256

    # Features as emitted by the frozen sparse backbone (TODO above).
    x = jax.random.normal(k_x, (N, C), dtype=jnp.float32)

    # BatchNormReLU(448) parameters (deterministic synthetic init), folded.
    eps = 1e-4  # scn default
    gamma = 1.0 + 0.1 * jax.random.normal(k_gamma, (C,), dtype=jnp.float32)
    beta = 0.1 * jax.random.normal(k_beta, (C,), dtype=jnp.float32)
    running_mean = 0.05 * jax.random.normal(k_mean, (C,), dtype=jnp.float32)
    running_var = jnp.abs(1.0 + 0.1 * jax.random.normal(k_var, (C,), dtype=jnp.float32))
    bn_scale = gamma / jnp.sqrt(running_var + eps)
    bn_shift = beta - running_mean * bn_scale

    # nn.Linear(448, 448): PyTorch weight is (out, in); kernel consumes (in, out).
    bound = 1.0 / jnp.sqrt(jnp.float32(C))
    w = jax.random.uniform(k_w, (C, C), minval=-bound, maxval=bound, dtype=jnp.float32)
    b = jax.random.uniform(k_b, (C,), minval=-bound, maxval=bound, dtype=jnp.float32)
    w_t = w.T  # (in, out)

    out = unet_dense_head(x, bn_scale, bn_shift, w_t, b)
    out = jax.block_until_ready(out)

    ref = _reference(x, bn_scale, bn_shift, w_t, b)
    assert out.shape == (N, C)
    # bf16 matmul with f32 accumulation over K=448 -> relaxed tolerance vs f32 ref.
    assert jnp.allclose(out, ref, atol=3e-2, rtol=3e-2), "mismatch vs reference"

    print("KERNEL_OK")
</pallas_src>

<mosaic_0001>
module attributes {stable_mosaic.version = 11 : i64} {
  func.func @_bn_relu_linear_kernel(%arg0: i32, %arg1: memref<128x512xf32, #tpu.memory_space<vmem>>, %arg2: memref<1x512xf32, #tpu.memory_space<vmem>>, %arg3: memref<1x512xf32, #tpu.memory_space<vmem>>, %arg4: memref<512x512xbf16, #tpu.memory_space<vmem>>, %arg5: memref<1x512xf32, #tpu.memory_space<vmem>>, %arg6: memref<128x512xf32, #tpu.memory_space<vmem>>) attributes {dimension_semantics = [#tpu.dimension_semantics<parallel>], iteration_bounds = array<i64: 2>, scalar_prefetch = 0 : i64, scratch_operands = 0 : i64, tpu.core_type = #tpu.core_type<tc>, window_params = [{transform_indices = @transform_0, window_bounds = array<i64: 128, 512>}, {pipeline_mode = #tpu.pipeline_mode<synchronous>, transform_indices = @transform_1, window_bounds = array<i64: 1, 512>}, {pipeline_mode = #tpu.pipeline_mode<synchronous>, transform_indices = @transform_2, window_bounds = array<i64: 1, 512>}, {pipeline_mode = #tpu.pipeline_mode<synchronous>, transform_indices = @transform_3, window_bounds = array<i64: 512, 512>}, {pipeline_mode = #tpu.pipeline_mode<synchronous>, transform_indices = @transform_4, window_bounds = array<i64: 1, 512>}, {transform_indices = @transform_5, window_bounds = array<i64: 128, 512>}]} {
    %c0 = arith.constant 0 : index
    %c0_0 = arith.constant 0 : index
    %0 = vector.load %arg1[%c0, %c0_0] : memref<128x512xf32, #tpu.memory_space<vmem>>, vector<128x512xf32>
    %c0_1 = arith.constant 0 : index
    %c0_2 = arith.constant 0 : index
    %1 = vector.load %arg2[%c0_1, %c0_2] : memref<1x512xf32, #tpu.memory_space<vmem>>, vector<1x512xf32>
    %2 = vector.broadcast %1 : vector<1x512xf32> to vector<128x512xf32>
    %3 = arith.mulf %0, %2 : vector<128x512xf32>
    %c0_3 = arith.constant 0 : index
    %c0_4 = arith.constant 0 : index
    %4 = vector.load %arg3[%c0_3, %c0_4] : memref<1x512xf32, #tpu.memory_space<vmem>>, vector<1x512xf32>
    %5 = vector.broadcast %4 : vector<1x512xf32> to vector<128x512xf32>
    %6 = arith.addf %3, %5 : vector<128x512xf32>
    %cst = arith.constant 0.000000e+00 : f32
    %7 = vector.broadcast %cst : f32 to vector<128x512xf32>
    %8 = arith.maximumf %6, %7 : vector<128x512xf32>
    %9 = arith.truncf %8 : vector<128x512xf32> to vector<128x512xbf16>
    %c0_5 = arith.constant 0 : index
    %c0_6 = arith.constant 0 : index
    %10 = vector.load %arg4[%c0_5, %c0_6] : memref<512x512xbf16, #tpu.memory_space<vmem>>, vector<512x512xbf16>
    %cst_7 = arith.constant dense<0.000000e+00> : vector<128x512xf32>
    %11 = tpu.matmul %9, %10, %cst_7 {dimension_numbers = #tpu.dot_dimension_numbers<[1], [0], [0], [1], [0, 0, 1, 1], [], []>} : vector<128x512xbf16>, vector<512x512xbf16>, vector<128x512xf32> -> vector<128x512xf32>
    %c0_8 = arith.constant 0 : index
    %c0_9 = arith.constant 0 : index
    %12 = vector.load %arg5[%c0_8, %c0_9] : memref<1x512xf32, #tpu.memory_space<vmem>>, vector<1x512xf32>
    %13 = vector.broadcast %12 : vector<1x512xf32> to vector<128x512xf32>
    %14 = arith.addf %11, %13 : vector<128x512xf32>
    %c0_10 = arith.constant 0 : index
    %c0_11 = arith.constant 0 : index
    %15 = vector.load %arg6[%c0_10, %c0_11] : memref<128x512xf32, #tpu.memory_space<vmem>>, vector<128x512xf32>
    tpu.vector_store %arg6[%c0_10, %c0_11], %14 {strides = array<i32>} : memref<128x512xf32, #tpu.memory_space<vmem>>, vector<128x512xf32>,
    return
  }
  func.func @transform_0(%arg0: i32) -> (i32, i32) {
    %c0_i32 = arith.constant 0 : i32
    %c0_i32_0 = arith.constant 0 : i32
    return %arg0, %c0_i32 : i32, i32
  }
  func.func @transform_1(%arg0: i32) -> (i32, i32) {
    %c0_i32 = arith.constant 0 : i32
    %c0_i32_0 = arith.constant 0 : i32
    %c0_i32_1 = arith.constant 0 : i32
    return %c0_i32, %c0_i32_0 : i32, i32
  }
  func.func @transform_2(%arg0: i32) -> (i32, i32) {
    %c0_i32 = arith.constant 0 : i32
    %c0_i32_0 = arith.constant 0 : i32
    %c0_i32_1 = arith.constant 0 : i32
    return %c0_i32, %c0_i32_0 : i32, i32
  }
  func.func @transform_3(%arg0: i32) -> (i32, i32) {
    %c0_i32 = arith.constant 0 : i32
    %c0_i32_0 = arith.constant 0 : i32
    %c0_i32_1 = arith.constant 0 : i32
    return %c0_i32, %c0_i32_0 : i32, i32
  }
  func.func @transform_4(%arg0: i32) -> (i32, i32) {
    %c0_i32 = arith.constant 0 : i32
    %c0_i32_0 = arith.constant 0 : i32
    %c0_i32_1 = arith.constant 0 : i32
    return %c0_i32, %c0_i32_0 : i32, i32
  }
  func.func @transform_5(%arg0: i32) -> (i32, i32) {
    %c0_i32 = arith.constant 0 : i32
    %c0_i32_0 = arith.constant 0 : i32
    return %arg0, %c0_i32 : i32, i32
  }
}

</mosaic_0001>

<bundles_post_ra>
// kernel: _dense_head_padded.1
= control target key start
LH: loop header
LB: loop body
LE: loop exit
PB: predicated region body
PF: predicated region fallthrough
CT: control target
= control target key end

     0   :  { %s3448_s0 = inlined_call_operand.hbm [shape: f32[256,512], index: 0, kind: input, shape index: {}]   ;;  %s3449_s1 = inlined_call_operand.hbm [shape: f32[1,512], index: 1, kind: input, shape index: {}]   ;;  %s3450_s2 = inlined_call_operand.vmem [shape: f32[1,512], index: 2, kind: input, shape index: {}]   ;;  %s3451_s3 = inlined_call_operand.hbm [shape: bf16[512,512], index: 3, kind: input, shape index: {}]   ;;  %s3452_s4 = inlined_call_operand.vmem [shape: f32[1,512], index: 4, kind: input, shape index: {}]   ;;  %s3453_s5 = inlined_call_operand.hbm [shape: f32[256,512], index: 5, kind: output, shape index: {}]  }
   0x1   :  { %3459 = sst [smem:[#allocation13_spill]] %s3449_s1 }
   0x2   :  { %10 = vsyncpa [#allocation3], 0 }
   0x3   :  { %12 = vsyncpa [#allocation3 + $0x1], 0 }
   0x4   :  { %13 = vsyncpa [#allocation6], 0 }
   0x5   :  { %14 = vsyncpa [#allocation4], 0 }
   0x6   :  { %16 = vsyncpa [#allocation4 + $0x1], 0  ;;  %s2761_s18 = smov 0   ;;  %s2763_s19 = smov 0  }
   0x7   :  { %s2765_s20 = smov 0   ;;  %s2767_s21 = smov 0  }
   0x8 LB: > { %s2782_s22 = sadd.s32 4294967295, %s2719_s21   ;;  %s2018_s23 = sadd.s32 4294967294, %s2719_s21   ;;  %s2719_s21 = sphi %s2767_s21, %s3482_s21   ;;  %s2715_s20 = sphi %s2765_s20, %s3481_s20   ;;  %s2711_s19 = sphi %s2763_s19, %s3480_s19   ;;  %s2707_s18 = sphi %s2761_s18, %s3479_s18  }
   0x9   : > { %s2786_s24 = sadd.s32 1, %s2719_s21   ;;  %s29_s25 = sadd.s32 1, %s2715_s20 }
   0xa   : > { %s26_s26 = ssub.s32 %s2719_s21, %s2786_s24  ;;  %p36_p0 = scmp.ne.s32.totalorder %s2715_s20, %s2711_s19 }
   0xb   : > { %p27_p1 = scmp.eq.s32.totalorder %s26_s26, 0  ;;  %p37_p2 = scmp.eq.s32.totalorder %s2719_s21, 0 }
   0xc   : > { %p42_p3 = scmp.ne.s32.totalorder %s2711_s19, %s2707_s18  ;;  %p3454_p4 = scmp.eq.s32.totalorder %s2782_s22, 0 }
   0xd   : > { %s2798_s27 = scalar_select %p27_p1, %s2715_s20, %s29_s25  }
   0xe   : > { %p2800_p5 = por %p37_p2, %p36_p0  ;;  %p2806_p6 = por %p3454_p4, %p42_p3 }
   0xf   : > { %3460 = sst [smem:[#allocation12_spill]] %s2798_s27  ;;  %p150_p7 = scmp.eq.s32.totalorder %s2782_s22, 1 }
  0x10   : > { %s3462_s29 = scalar_select %p2806_p6, 1, 0 }
  0x11   : > { %p156_p8 = scmp.eq.s32.totalorder %s2018_s23, 1  ;;  %p2019_p9 = scmp.ge.s32.totalorder %s2719_s21, 1 }
  0x12   : > { %p163_p10 = scmp.lt.s32.totalorder %s2719_s21, 3  ;;  %p2813_p11 = por %p150_p7, %p36_p0 }
  0x13   : > { %p2817_p12 = por %p156_p8, %p42_p3  ;;  %s2721_s8 = smov [#allocation5]  }
  0x14   : > { %s3463_s30 = scalar_select %p2813_p11, 1, 0 }
  0x15   : > { %s3464_s6 = scalar_select %p2817_p12, 1, 0 }
  0x16   : > { %p2821_p13 = pnand %p2019_p9, %p163_p10  ;;  %s176_s9 = sshll.u32 %s2721_s8, 4  ;;  %s177_s9 = int_to_ptr.vmem [resolvable:$true] %s176_s9 }
  0x17   : > { %p2327_p4 = scmp.lt.s32.totalorder %s2719_s21, 2  ;;  %p3466_p0 = scmp.eq.s32.totalorder %s2782_s22, 0 }
  0x18   : > { %s3465_s7 = scalar_select %p2821_p13, 1, 0 }
  0x19   : > { %p2310_p2 = pneg %p2821_p13  ;;  %p2837_p3 = pnand %p2327_p4, %p2800_p5 }
  0x1a   : > { %s2722_s12 = smov [#allocation7]   ;;  %s3469_s1 = sld [smem:[#allocation13_spill]] }
  0x1b   : > { %p2831_p7 = pnand %p2310_p2, %p3466_p0  ;;  %s189_s13 = sshll.u32 %s2722_s12, 4  ;;  %s2841_s13 = int_to_ptr.vmem [resolvable:$true] %s189_s13 }
  0x1c   : > { %s3468_s11 = scalar_select %p2837_p3, 1, 0 }
  0x1d   : > { %p2565_p9 = pneg %p2831_p7 }
  0x20   : > { %s2563_s16 = scalar_lea.hbm %s3469_s1, 64 }
  0x21   : > { %p2564_p8 = scmp.ne.s32.totalorder %s3469_s1, %s2563_s16  ;;  %p2570_p10 = scmp.lt.u32.totalorder %s2563_s16, %s3469_s1 }
  0x23   : > { %p2566_p4 = pnand %p2565_p9, %p2564_p8 }
  0x25   : > { %p2567_p5 = pneg %p2566_p4 }
  0x27   : > { %p2572_p2 = pnand %p2570_p10, %p2567_p5 }
  0x29   : > { %2575 = shalt.err (!%p2572_p2)
}
  0x2a   : > { %s2576_s28 = scalar_lea.vmem %s177_s9, 64  ;;  %p2584_p11 = scmp.lt.s32.totalorder %s177_s9, %s177_s9 }
  0x2b   : > { %p2577_p0 = scmp.ne.s32.totalorder %s177_s9, %s2576_s28  ;;  %p2585_p6 = scmp.lt.s32.totalorder %s2576_s28, %s2576_s28 }
  0x2d   : > { %p2579_p1 = pnand %p2577_p0, %p2565_p9  ;;  %p2586_p13 = por %p2585_p6, %p2584_p11 }
  0x2f   : > { %p2580_p12 = pneg %p2579_p1 }
  0x31   : > { %p2587_p3 = pnand %p2586_p13, %p2580_p12 }
  0x33   : > { %2590 = shalt.err (!%p2587_p3)
}
  0x34   : > { %2313 = dma.hbm_to_vmem [thread:$0]  (!%p2831_p7), %s3469_s1, 64, %s177_s9, [#allocation6]  }
  0x35   : > { %s206_s14 = sand.u32 1, %s2715_s20   ;;  %s2591_s17 = scalar_lea.hbm %s3451_s3, 16384 }
  0x36   : > { %p2592_p1 = scmp.ne.s32.totalorder %s3451_s3, %s2591_s17  ;;  %p2598_p12 = scmp.lt.u32.totalorder %s2591_s17, %s3451_s3 }
  0x38   : > { %p2594_p6 = pnand %p2592_p1, %p2565_p9 }
  0x3a   : > { %p2595_p11 = pneg %p2594_p6 }
  0x3c   : > { %p2600_p13 = pnand %p2598_p12, %p2595_p11 }
  0x3e   : > { %2603 = shalt.err (!%p2600_p13)
}
  0x3f   : > { %s2604_s9 = scalar_lea.vmem %s2841_s13, 16384  ;;  %p2612_p5 = scmp.lt.s32.totalorder %s2841_s13, %s2841_s13 }
  0x40   : > { %p2605_p3 = scmp.ne.s32.totalorder %s2841_s13, %s2604_s9  ;;  %p2613_p10 = scmp.lt.s32.totalorder %s2604_s9, %s2604_s9 }
  0x42   : > { %p2607_p8 = pnand %p2605_p3, %p2565_p9  ;;  %p2614_p2 = por %p2613_p10, %p2612_p5 }
  0x44   : > { %p2608_p4 = pneg %p2607_p8 }
  0x46   : > { %p2615_p0 = pnand %p2614_p2, %p2608_p4 }
  0x48   : > { %2618 = shalt.err (!%p2615_p0)
}
  0x49   : > { %s2723_s8 = smov 256   ;;  %s2724_s12 = smov 16  }
  0x4a   : > { %2316 = dma.hbm_to_vmem [thread:$0]  (!%p2831_p7), %s3451_s3, 16384, %s2841_s13, [#allocation6], %s2723_s8, %s2723_s8, %s2724_s12  }
  0x4b   : > { %s2023_s17 = sshll.u32 %s206_s14, 9  ;;  %s2167_s23 = sshll.u32 %s2719_s21, 13 }
  0x4c   : > { %s2895_s28 = scalar_lea.hbm %s3448_s0, %s2167_s23  ;;  %s210_s9 = scalar_lea.vmem [#allocation2], %s2023_s17 }
  0x4d   : > { %s218_s1 = sshll.u32 %s210_s9, 4  ;;  %s2899_s10 = scalar_lea.sflag [#allocation3], %s206_s14  ;;  %s2897_s1 = int_to_ptr.vmem [resolvable:$true] %s218_s1 }
  0x4e   : > { %s2619_s27 = scalar_lea.hbm %s2895_s28, 8192  ;;  %p3470_p7 = scmp.ne.s32.totalorder %s3468_s11, 0 }
  0x4f   : > { %p2620_p9 = scmp.ne.s32.totalorder %s2895_s28, %s2619_s27  ;;  %s2624_s12 = scalar_lea.hbm %s3448_s0, 16384 }
  0x50   : > { %p2621_p1 = pneg %p3470_p7  ;;  %p2625_p12 = scmp.lt.u32.totalorder %s2895_s28, %s3448_s0 }
  0x51   : > { %p2626_p13 = scmp.lt.u32.totalorder %s2624_s12, %s2619_s27  ;;  %p2628_p8 = scmp.lt.u32.totalorder %s2619_s27, %s2895_s28 }
  0x52   : > { %p2622_p6 = pnand %p2621_p1, %p2620_p9 }
  0x53   : > { %p2627_p3 = por %p2626_p13, %p2625_p12 }
  0x54   : > { %p2623_p11 = pneg %p2622_p6 }
  0x55   : > { %p2629_p4 = por %p2628_p8, %p2627_p3 }
  0x57   : > { %p2630_p5 = pnand %p2629_p4, %p2623_p11 }
  0x59   : > { %2633 = shalt.err (!%p2630_p5)
}
  0x5a   : > { %s2634_s14 = scalar_lea.vmem %s2897_s1, 8192  ;;  %s2725_s17 = smov [#allocation2]  }
  0x5b   : > { %p2635_p10 = scmp.ne.s32.totalorder %s2897_s1, %s2634_s14  ;;  %s2639_s23 = sshll.u32 %s2725_s17, 4  ;;  %s2640_s23 = int_to_ptr.vmem [resolvable:$false] %s2639_s23 }
  0x5c   : > { %s2641_s25 = scalar_lea.vmem %s2640_s23, 16384  ;;  %p2642_p9 = scmp.lt.s32.totalorder %s2897_s1, %s2640_s23 }
  0x5d   : > { %p2637_p2 = pnand %p2635_p10, %p2621_p1  ;;  %p2643_p6 = scmp.lt.s32.totalorder %s2641_s25, %s2634_s14 }
  0x5f   : > { %p2638_p0 = pneg %p2637_p2  ;;  %p2644_p12 = por %p2643_p6, %p2642_p9 }
  0x61   : > { %p2645_p13 = pnand %p2644_p12, %p2638_p0 }
  0x63   : > { %2648 = shalt.err (!%p2645_p13)
}
  0x64   : > { %s2726_s27 = smov 512   ;;  %s2727_s26 = smov 32  }
  0x65   : > { %2320 = dma.hbm_to_vmem [thread:$0]  (!%p3470_p7), %s2895_s28, 8192, %s2897_s1, %s2899_s10, %s2726_s27, %s2726_s27, %s2727_s26  }
  0x66   : > { %p3471_p1 = scmp.ne.s32.totalorder %s3465_s7, 0 }
  0x67   : > { %s2930_s9 = sand.u32 (!%p3471_p1), 1, %s2711_s19   ;;  %p3472_p11 = scmp.ne.s32.totalorder (!%p3471_p1), %s3462_s29, 0 }
  0x68   : > { %230 = sbr.rel (%p3471_p1) target bundleno = 532 (0x214), region = 40  ;;  %s2028_s13 = sshll.u32 (!%p3471_p1), %s2930_s9, 9 }
  0x69   : > { %s233_s8 = scalar_lea.sflag (!%p3471_p1), [#allocation3], %s2930_s9  ;;  %s2936_s12 = scalar_lea.vmem (!%p3471_p1), [#allocation2], %s2028_s13 }
  0x6f   : > { %2694 = dma.done.wait (%p3472_p11), %s233_s8, 8192  }
  0x70   : > { %2696 = vsyncadd (%p3472_p11), %s233_s8, 4294959104  ;;  %p3473_p7 = scmp.eq.s32.totalorder %s2782_s22, 0 }
  0x72   : > { %2698 = dma.done.wait (%p3473_p7), [#allocation6], 16448   ;;  %p3474_p3 = pmov %p3473_p7 }
  0x73   : > { %v2371_v0 = vld [vmem:[#allocation7 + $0x4] ss:$16 sps:$4 sm:$0xff]   ;;  %v2373_v1 = vld [vmem:[#allocation7 + $0xc] ss:$16 sps:$4 sm:$0xff]   ;;  %v2375_v2 = vld [vmem:[#allocation7] ss:$16 sps:$4 sm:$0xff]   ;;  %v339_v37 = vlaneseq }
  0x74   : > { %2700 = vsyncadd (%p3474_p3), [#allocation6], 4294950848  ;;  %1395 = vmatprep.subr.bf16.mxu0 %v2371_v0  ;;  %v2376_v3 = vld [vmem:[#allocation7 + $0x8] ss:$16 sps:$4 sm:$0xff]   ;;  %1621 = vmatprep.subr.bf16.mxu1 %v2373_v1  ;;  %v2377_v4 = vld [vmem:[#allocation7 + $0x24] ss:$16 sps:$4 sm:$0xff]  }
  0x75   : > { %1396 = vmatpush1.bf16.msra.mxu0 %v2375_v2  ;;  %1622 = vmatpush1.bf16.msra.mxu1 %v2376_v3  ;;  %v2379_v5 = vld [vmem:[#allocation7 + $0x2c] ss:$16 sps:$4 sm:$0xff]   ;;  %v2381_v6 = vld [vmem:[#allocation7 + $0x20] ss:$16 sps:$4 sm:$0xff]   ;;  %v2382_v7 = vld [vmem:[#allocation7 + $0x28] ss:$16 sps:$4 sm:$0xff]  }
  0x76   : > { %1397 = vmatprep.subr.bf16.mxu0 %v2377_v4  ;;  %1623 = vmatprep.subr.bf16.mxu1 %v2379_v5  ;;  %v2383_v8 = vld [vmem:[#allocation7 + $0x44] ss:$16 sps:$4 sm:$0xff]   ;;  %v2385_v9 = vld [vmem:[#allocation7 + $0x4c] ss:$16 sps:$4 sm:$0xff]   ;;  %v2387_v10 = vld [vmem:[#allocation7 + $0x40] ss:$16 sps:$4 sm:$0xff]  }
  0x77   : > { %v2388_v11 = vld [vmem:[#allocation7 + $0x48] ss:$16 sps:$4 sm:$0xff]   ;;  %v2389_v12 = vld [vmem:[#allocation7 + $0x64] ss:$16 sps:$4 sm:$0xff]   ;;  %v2391_v13 = vld [vmem:[#allocation7 + $0x6c] ss:$16 sps:$4 sm:$0xff]  }
  0x78   : > { %v2393_v14 = vld [vmem:[#allocation7 + $0x60] ss:$16 sps:$4 sm:$0xff]   ;;  %v2394_v15 = vld [vmem:[#allocation7 + $0x68] ss:$16 sps:$4 sm:$0xff]   ;;  %v2395_v16 = vld [vmem:[#allocation7 + $0x84] ss:$16 sps:$4 sm:$0xff]  }
  0x79   : > { %1398 = vmatpush1.bf16.msra.mxu0 %v2381_v6  ;;  %1624 = vmatpush1.bf16.msra.mxu1 %v2382_v7  ;;  %v2397_v17 = vld [vmem:[#allocation7 + $0x8c] ss:$16 sps:$4 sm:$0xff]   ;;  %v2399_v18 = vld [vmem:[#allocation7 + $0x80] ss:$16 sps:$4 sm:$0xff]   ;;  %v2400_v19 = vld [vmem:[#allocation7 + $0x88] ss:$16 sps:$4 sm:$0xff]  }
  0x7a   : > { %1399 = vmatprep.subr.bf16.mxu0 %v2383_v8  ;;  %1625 = vmatprep.subr.bf16.mxu1 %v2385_v9  ;;  %v2401_v20 = vld [vmem:[#allocation7 + $0xa4] ss:$16 sps:$4 sm:$0xff]   ;;  %v2403_v21 = vld [vmem:[#allocation7 + $0xac] ss:$16 sps:$4 sm:$0xff]   ;;  %v2405_v22 = vld [vmem:[#allocation7 + $0xa0] ss:$16 sps:$4 sm:$0xff]  }
  0x7b   : > { %v2406_v23 = vld [vmem:[#allocation7 + $0xa8] ss:$16 sps:$4 sm:$0xff]   ;;  %v2407_v24 = vld [vmem:[#allocation7 + $0xc4] ss:$16 sps:$4 sm:$0xff]   ;;  %v2409_v25 = vld [vmem:[#allocation7 + $0xcc] ss:$16 sps:$4 sm:$0xff]  }
  0x7c   : > { %v2411_v26 = vld [vmem:[#allocation7 + $0xc0] ss:$16 sps:$4 sm:$0xff]   ;;  %v2412_v27 = vld [vmem:[#allocation7 + $0xc8] ss:$16 sps:$4 sm:$0xff]   ;;  %v2413_v28 = vld [vmem:[#allocation7 + $0xe4] ss:$16 sps:$4 sm:$0xff]  }
  0x7d   : > { %1400 = vmatpush1.bf16.msra.mxu0 %v2387_v10  ;;  %1626 = vmatpush1.bf16.msra.mxu1 %v2388_v11  ;;  %v2415_v29 = vld [vmem:[#allocation7 + $0xec] ss:$16 sps:$4 sm:$0xff]   ;;  %v2417_v30 = vld [vmem:[#allocation7 + $0xe0] ss:$16 sps:$4 sm:$0xff]   ;;  %v2418_v31 = vld [vmem:[#allocation7 + $0xe8] ss:$16 sps:$4 sm:$0xff]  }
  0x7e   : > { %1401 = vmatprep.subr.bf16.mxu0 %v2389_v12  ;;  %1627 = vmatprep.subr.bf16.mxu1 %v2391_v13  ;;  %v2419_v32 = vld [vmem:[#allocation7 + $0x104] ss:$16 sps:$4 sm:$0xff]   ;;  %v2421_v33 = vld [vmem:[#allocation7 + $0x10c] ss:$16 sps:$4 sm:$0xff]   ;;  %v2423_v34 = vld [vmem:[#allocation7 + $0x100] ss:$16 sps:$4 sm:$0xff]  }
  0x7f   : > { %v2424_v35 = vld [vmem:[#allocation7 + $0x108] ss:$16 sps:$4 sm:$0xff]   ;;  %v2425_v36 = vld [vmem:[#allocation7 + $0x124] ss:$16 sps:$4 sm:$0xff]   ;;  %v2427_v38 = vld [vmem:[#allocation7 + $0x12c] ss:$16 sps:$4 sm:$0xff]  }
  0x80   : > { %v2429_v39 = vld [vmem:[#allocation7 + $0x120] ss:$16 sps:$4 sm:$0xff]   ;;  %v2430_v40 = vld [vmem:[#allocation7 + $0x128] ss:$16 sps:$4 sm:$0xff]   ;;  %v2431_v41 = vld [vmem:[#allocation7 + $0x144] ss:$16 sps:$4 sm:$0xff]  }
  0x81   : > { %1402 = vmatpush1.bf16.msra.mxu0 %v2393_v14  ;;  %1628 = vmatpush1.bf16.msra.mxu1 %v2394_v15  ;;  %v2946_v42 = vshrl.u32 %v339_v37, 7  ;;  %v2433_v43 = vld [vmem:[#allocation7 + $0x14c] ss:$16 sps:$4 sm:$0xff]   ;;  %v2435_v44 = vld [vmem:[#allocation7 + $0x140] ss:$16 sps:$4 sm:$0xff]   ;;  %v274_v49 = vld [vmem:[%s2936_s12 + $0x8] sm:$0xff] }
  0x82   : > { %1403 = vmatprep.subr.bf16.mxu0 %v2395_v16  ;;  %1629 = vmatprep.subr.bf16.mxu1 %v2397_v17  ;;  %v2436_v45 = vld [vmem:[#allocation7 + $0x148] ss:$16 sps:$4 sm:$0xff]   ;;  %v2437_v46 = vld [vmem:[#allocation7 + $0x164] ss:$16 sps:$4 sm:$0xff]   ;;  %v2439_v48 = vld [vmem:[#allocation7 + $0x16c] ss:$16 sps:$4 sm:$0xff]  }
  0x83   : > { %v2949_v47 = vsub.s32 1, %v2946_v42  ;;  %v278_v50 = vld [vmem:[%s2936_s12 + $0x28] sm:$0xff]  ;;  %v2953_v51 = vld [vmem:[#allocation5] sm:$0xf]  ;;  %v2961_v53 = vsub.s32 0, %v2946_v42  ;;  %s3271_s28 = scalar_lea.vmem [#allocation8], %s2028_s13 }
  0x84   : > { %v2958_v52 = vld [vmem:[%s3450_s2] sm:$0xf]  ;;  %v2441_v54 = vld [vmem:[#allocation7 + $0x160] ss:$16 sps:$4 sm:$0xff]   ;;  %v2442_v55 = vld [vmem:[#allocation7 + $0x168] ss:$16 sps:$4 sm:$0xff]  }
  0x85   : > { %1404 = vmatpush1.bf16.msra.mxu0 %v2399_v18  ;;  %1630 = vmatpush1.bf16.msra.mxu1 %v2400_v19  ;;  %v2965_v56 = vrot.slane %v2953_v51, %v2949_v47  ;;  %v2969_v57 = vrot.slane %v2958_v52, %v2949_v47  ;;  %v2443_v58 = vld [vmem:[#allocation7 + $0x184] ss:$16 sps:$4 sm:$0xff]   ;;  %v2445_v59 = vld [vmem:[#allocation7 + $0x18c] ss:$16 sps:$4 sm:$0xff]   ;;  %v2447_v60 = vld [vmem:[#allocation7 + $0x180] ss:$16 sps:$4 sm:$0xff]   ;;  %v2975_v0 = vrot.slane %v2953_v51, %v2961_v53 }
  0x86   : > { %1405 = vmatprep.subr.bf16.mxu0 %v2401_v20  ;;  %1631 = vmatprep.subr.bf16.mxu1 %v2403_v21  ;;  %v2448_v63 = vld [vmem:[#allocation7 + $0x188] ss:$16 sps:$4 sm:$0xff]   ;;  %v273_v3 = vld [vmem:[%s2936_s12] sm:$0xff]  ;;  %v2449_v5 = vld [vmem:[#allocation7 + $0x1a4] ss:$16 sps:$4 sm:$0xff]   ;;  %v2986_v12 = vrot.slane %v2958_v52, %v2961_v53  ;;  %s2169_s10 = sshll.u32 %s2782_s22, 13 }
  0x87   : > { %v360_v61 = vmul.f32 %v2965_v56, %v274_v49  ;;  %v364_v62 = vmul.f32 %v2965_v56, %v278_v50  ;;  %v277_v4 = vld [vmem:[%s2936_s12 + $0x20] sm:$0xff]  ;;  %v282_v9 = vld [vmem:[%s2936_s12 + $0x48] sm:$0xff]  ;;  %v359_v10 = vmul.f32 %v2975_v0, %v273_v3  ;;  %s1926_s15 = sshll.u32 %s3271_s28, 4  ;;  %s3394_s14 = scalar_lea.hbm %s3453_s5, %s2169_s10  ;;  %s3396_s15 = int_to_ptr.vmem [resolvable:$true] %s1926_s15 }
  0x88   : > { %v2451_v6 = vld [vmem:[#allocation7 + $0x1ac] ss:$16 sps:$4 sm:$0xff]   ;;  %v363_v11 = vmul.f32 %v2975_v0, %v277_v4  ;;  %v286_v13 = vld [vmem:[%s2936_s12 + $0x68] sm:$0xff]  ;;  %v2453_v14 = vld [vmem:[#allocation7 + $0x1a0] ss:$16 sps:$4 sm:$0xff]   ;;  %v368_v19 = vmul.f32 %v2965_v56, %v282_v9  ;;  %s1912_s17 = scalar_lea.sflag [#allocation4], %s2930_s9 }
  0x89   : > { %1406 = vmatpush1.bf16.msra.mxu0 %v2405_v22  ;;  %1632 = vmatpush1.bf16.msra.mxu1 %v2406_v23  ;;  %v446_v1 = vadd.f32 %v2969_v57, %v360_v61  ;;  %v450_v2 = vadd.f32 %v2969_v57, %v364_v62  ;;  %v2454_v15 = vld [vmem:[#allocation7 + $0x1a8] ss:$16 sps:$4 sm:$0xff]   ;;  %v2455_v17 = vld [vmem:[#allocation7 + $0x1c4] ss:$16 sps:$4 sm:$0xff]   ;;  %v2457_v18 = vld [vmem:[#allocation7 + $0x1cc] ss:$16 sps:$4 sm:$0xff]   ;;  %v372_v20 = vmul.f32 %v2965_v56, %v286_v13 }
  0x8a   : > { %1407 = vmatprep.subr.bf16.mxu0 %v2407_v24  ;;  %1633 = vmatprep.subr.bf16.mxu1 %v2409_v25  ;;  %v2459_v21 = vld [vmem:[#allocation7 + $0x1c0] ss:$16 sps:$4 sm:$0xff]   ;;  %v445_v22 = vadd.f32 %v2986_v12, %v359_v10  ;;  %v449_v23 = vadd.f32 %v2986_v12, %v363_v11  ;;  %v2460_v24 = vld [vmem:[#allocation7 + $0x1c8] ss:$16 sps:$4 sm:$0xff]   ;;  %v2481_v9 = vld [vmem:[#allocation7 + $0x244] ss:$16 sps:$4 sm:$0xff]  }
  0x8b   : > { %v510_v7 = vmax.f32 %v446_v1, 0.0  ;;  %v514_v8 = vmax.f32 %v450_v2, 0.0  ;;  %v281_v25 = vld [vmem:[%s2936_s12 + $0x40] sm:$0xff]  ;;  %v294_v37 = vld [vmem:[%s2936_s12 + $0xa8] sm:$0xff]  ;;  %s2649_s23 = scalar_lea.vmem %s3396_s15, 8192  ;;  %p3475_p4 = scmp.ne.s32.totalorder %s3463_s30, 0 }
  0x8c   : > { %v2470_v49 = vld [vmem:[#allocation7 + $0x208] ss:$16 sps:$4 sm:$0xff]   ;;  %v2473_v61 = vld [vmem:[#allocation7 + $0x220] ss:$16 sps:$4 sm:$0xff]   ;;  %v2484_v10 = vld [vmem:[#allocation7 + $0x24c] ss:$16 sps:$4 sm:$0xff]   ;;  %p2650_p8 = scmp.ne.s32.totalorder %s3396_s15, %s2649_s23 }
  0x8d   : > { %1408 = vmatpush1.bf16.msra.mxu0 %v2411_v26  ;;  %1634 = vmatpush1.bf16.msra.mxu1 %v2412_v27  ;;  %v574_v16 = vpack.c.bf16 %v514_v8, %v510_v7  ;;  %v285_v26 = vld [vmem:[%s2936_s12 + $0x60] sm:$0xff]  ;;  %v2461_v27 = vld [vmem:[#allocation7 + $0x1e4] ss:$16 sps:$4 sm:$0xff]   ;;  %v2476_v62 = vld [vmem:[#allocation7 + $0x228] ss:$16 sps:$4 sm:$0xff]   ;;  %s2728_s25 = smov [#allocation8]  }
  0x8e   : > { %1409 = vmatprep.subr.bf16.mxu0 %v2413_v28  ;;  %1635 = vmatprep.subr.bf16.mxu1 %v2415_v29  ;;  %v2463_v28 = vld [vmem:[#allocation7 + $0x1ec] ss:$16 sps:$4 sm:$0xff]   ;;  %v2465_v29 = vld [vmem:[#allocation7 + $0x1e0] ss:$16 sps:$4 sm:$0xff]   ;;  %v298_v7 = vld [vmem:[%s2936_s12 + $0xc8] sm:$0xff]  ;;  %p2651_p5 = pnand %p2650_p8, %p3475_p4  ;;  %s2653_s27 = sshll.u32 %s2728_s25, 4  ;;  %s2654_s27 = int_to_ptr.vmem [resolvable:$false] %s2653_s27 }
  0x8f   : > { %1427 = vmatprep.mubr.bf16.mxu0 %v574_v16  ;;  %1653 = vmatprep.mubr.bf16.mxu1 %v574_v16  ;;  %v302_v8 = vld [vmem:[%s2936_s12 + $0xe8] sm:$0xff]  ;;  %s2655_s26 = scalar_lea.vmem %s2654_s27, 16384  ;;  %p2656_p2 = scmp.lt.s32.totalorder %s3396_s15, %s2654_s27 }
  0x90   : > { %p2652_p10 = pneg %p2651_p5  ;;  %p2657_p0 = scmp.lt.s32.totalorder %s2655_s26, %s2649_s23 }
  0x91   : > { %1410 = vmatpush1.bf16.msra.mxu0 %v2417_v30  ;;  %1636 = vmatpush1.bf16.msra.mxu1 %v2418_v31  ;;  %v454_v30 = vadd.f32 %v2969_v57, %v368_v19  ;;  %v458_v31 = vadd.f32 %v2969_v57, %v372_v20 }
  0x92   : > { %1411 = vmatprep.subr.bf16.mxu0 %v2419_v32  ;;  %1637 = vmatprep.subr.bf16.mxu1 %v2421_v33  ;;  %v509_v32 = vmax.f32 %v445_v22, 0.0  ;;  %v513_v33 = vmax.f32 %v449_v23, 0.0  ;;  %v301_v22 = vld [vmem:[%s2936_s12 + $0xe0] sm:$0xff]  ;;  %v2487_v23 = vld [vmem:[#allocation7 + $0x264] ss:$16 sps:$4 sm:$0xff]   ;;  %p2658_p9 = por %p2657_p0, %p2656_p2 }
  0x94   : > { %p2659_p6 = pnand %p2658_p9, %p2652_p10 }
  0x95   : > { %1412 = vmatpush1.bf16.msra.mxu0 %v2423_v34  ;;  %1638 = vmatpush1.bf16.msra.mxu1 %v2424_v35  ;;  %v367_v34 = vmul.f32 %v2975_v0, %v281_v25  ;;  %v371_v35 = vmul.f32 %v2975_v0, %v285_v26  ;;  %v2485_v25 = vld [vmem:[#allocation7 + $0x260] ss:$16 sps:$4 sm:$0xff]   ;;  %v2488_v26 = vld [vmem:[#allocation7 + $0x268] ss:$16 sps:$4 sm:$0xff]  }
  0x96   : > { %1413 = vmatprep.subr.bf16.mxu0 %v2425_v36  ;;  %1639 = vmatprep.subr.bf16.mxu1 %v2427_v38  ;;  %v290_v36 = vld [vmem:[%s2936_s12 + $0x88] sm:$0xff] }
  0x97   : > { %v2466_v38 = vld [vmem:[#allocation7 + $0x1e8] ss:$16 sps:$4 sm:$0xff]   ;;  %v453_v50 = vadd.f32 %v2986_v12, %v367_v34  ;;  %v387_v34 = vmul.f32 %v2975_v0, %v301_v22 }
  0x99   : > { %1414 = vmatpush1.bf16.msra.mxu0 %v2429_v39  ;;  %1640 = vmatpush1.bf16.msra.mxu1 %v2430_v40  ;;  %v2469_v39 = vld [vmem:[#allocation7 + $0x204] ss:$16 sps:$4 sm:$0xff]   ;;  %v2472_v40 = vld [vmem:[#allocation7 + $0x20c] ss:$16 sps:$4 sm:$0xff]   ;;  %v517_v3 = vmax.f32 %v453_v50, 0.0 }
  0x9a   : > { %1415 = vmatprep.subr.bf16.mxu0 %v2431_v41  ;;  %1641 = vmatprep.subr.bf16.mxu1 %v2433_v43  ;;  %v518_v41 = vmax.f32 %v454_v30, 0.0  ;;  %v522_v43 = vmax.f32 %v458_v31, 0.0  ;;  %v306_v30 = vld [vmem:[%s2936_s12 + $0x108] sm:$0xff] }
  0x9d   : > { %1416 = vmatpush1.bf16.msra.mxu0 %v2435_v44  ;;  %1642 = vmatpush1.bf16.msra.mxu1 %v2436_v45  ;;  %v376_v44 = vmul.f32 %v2965_v56, %v290_v36  ;;  %v380_v45 = vmul.f32 %v2965_v56, %v294_v37  ;;  %v305_v36 = vld [vmem:[%s2936_s12 + $0x100] sm:$0xff]  ;;  %v2493_v37 = vld [vmem:[#allocation7 + $0x284] ss:$16 sps:$4 sm:$0xff]  }
  0x9e   : > { %1417 = vmatprep.subr.bf16.mxu0 %v2437_v46  ;;  %1643 = vmatprep.subr.bf16.mxu1 %v2439_v48  ;;  %v573_v46 = vpack.c.bf16 %v513_v33, %v509_v32  ;;  %v2467_v48 = vld [vmem:[#allocation7 + $0x200] ss:$16 sps:$4 sm:$0xff]  }
  0x9f   : > { %v462_v1 = vadd.f32 %v2969_v57, %v376_v44  ;;  %v466_v2 = vadd.f32 %v2969_v57, %v380_v45  ;;  %v392_v45 = vmul.f32 %v2965_v56, %v306_v30 }
  0xa1   : > { %1418 = vmatpush1.bf16.msra.mxu0 %v2441_v54  ;;  %1644 = vmatpush1.bf16.msra.mxu1 %v2442_v55  ;;  %v457_v54 = vadd.f32 %v2986_v12, %v371_v35  ;;  %v2475_v55 = vld [vmem:[#allocation7 + $0x224] ss:$16 sps:$4 sm:$0xff]   ;;  %v526_v11 = vmax.f32 %v462_v1, 0.0  ;;  %v530_v13 = vmax.f32 %v466_v2, 0.0  ;;  %v478_v2 = vadd.f32 %v2969_v57, %v392_v45  ;;  %v2512_v45 = vld [vmem:[#allocation7 + $0x2e8] ss:$16 sps:$4 sm:$0xff]  }
  0xa2   : > { %1419 = vmatprep.subr.bf16.mxu0 %v2443_v58  ;;  %1645 = vmatprep.subr.bf16.mxu1 %v2445_v59  ;;  %v289_v58 = vld [vmem:[%s2936_s12 + $0x80] sm:$0xff]  ;;  %v310_v35 = vld [vmem:[%s2936_s12 + $0x128] sm:$0xff] }
  0xa3   : > { %v293_v59 = vld [vmem:[%s2936_s12 + $0xa0] sm:$0xff]  ;;  %v521_v4 = vmax.f32 %v457_v54, 0.0  ;;  %v473_v54 = vadd.f32 %v2986_v12, %v387_v34 }
  0xa5   : > { %1420 = vmatpush1.bf16.msra.mxu0 %v2447_v60  ;;  %1646 = vmatpush1.bf16.msra.mxu1 %v2448_v63  ;;  %v2478_v60 = vld [vmem:[#allocation7 + $0x22c] ss:$16 sps:$4 sm:$0xff]   ;;  %v578_v63 = vpack.c.bf16 %v522_v43, %v518_v41  ;;  %v577_v16 = vpack.c.bf16 %v521_v4, %v517_v3  ;;  %v2494_v41 = vld [vmem:[#allocation7 + $0x288] ss:$16 sps:$4 sm:$0xff]  }
  0xa6   : > { %1421 = vmatprep.subr.bf16.mxu0 %v2449_v5  ;;  %1647 = vmatprep.subr.bf16.mxu1 %v2451_v6  ;;  %v375_v5 = vmul.f32 %v2975_v0, %v289_v58  ;;  %v379_v6 = vmul.f32 %v2975_v0, %v293_v59  ;;  %v2502_v58 = vld [vmem:[#allocation7 + $0x2ac] ss:$16 sps:$4 sm:$0xff]  }
  0xa7   : > { %v317_v4 = vld [vmem:[%s2936_s12 + $0x160] sm:$0xff] }
  0xa8   : > { %v461_v19 = vadd.f32 %v2986_v12, %v375_v5  ;;  %v465_v20 = vadd.f32 %v2986_v12, %v379_v6  ;;  %v2500_v5 = vld [vmem:[#allocation7 + $0x2a8] ss:$16 sps:$4 sm:$0xff]  }
  0xa9   : > { %1422 = vmatpush1.bf16.msra.mxu0 %v2453_v14  ;;  %1648 = vmatpush1.bf16.msra.mxu1 %v2454_v15  ;;  %v384_v14 = vmul.f32 %v2965_v56, %v298_v7  ;;  %v388_v15 = vmul.f32 %v2965_v56, %v302_v8  ;;  %v537_v7 = vmax.f32 %v473_v54, 0.0 }
  0xaa   : > { %1423 = vmatprep.subr.bf16.mxu0 %v2455_v17  ;;  %1649 = vmatprep.subr.bf16.mxu1 %v2457_v18  ;;  %v2479_v17 = vld [vmem:[#allocation7 + $0x240] ss:$16 sps:$4 sm:$0xff]   ;;  %v2482_v18 = vld [vmem:[#allocation7 + $0x248] ss:$16 sps:$4 sm:$0xff]   ;;  %v525_v31 = vmax.f32 %v461_v19, 0.0  ;;  %v529_v32 = vmax.f32 %v465_v20, 0.0 }
  0xab   : > { %v321_v19 = vld [vmem:[%s2936_s12 + $0x180] sm:$0xff]  ;;  %v542_v20 = vmax.f32 %v478_v2, 0.0 }
  0xad   : > { %1424 = vmatpush1.bf16.msra.mxu0 %v2459_v21  ;;  %1650 = vmatpush1.bf16.msra.mxu1 %v2460_v24  ;;  %v297_v21 = vld [vmem:[%s2936_s12 + $0xc0] sm:$0xff] }
  0xae   : > { %1425 = vmatprep.subr.bf16.mxu0 %v2461_v27  ;;  %1651 = vmatprep.subr.bf16.mxu1 %v2463_v28  ;;  %v2490_v24 = vld [vmem:[#allocation7 + $0x26c] ss:$16 sps:$4 sm:$0xff]   ;;  %v582_v27 = vpack.c.bf16 %v530_v13, %v526_v11  ;;  %v470_v28 = vadd.f32 %v2969_v57, %v384_v14  ;;  %v383_v33 = vmul.f32 %v2975_v0, %v297_v21 }
  0xb0   : > { %v534_v43 = vmax.f32 %v470_v28, 0.0  ;;  %v469_v50 = vadd.f32 %v2986_v12, %v383_v33  ;;  %v2506_v28 = vld [vmem:[#allocation7 + $0x2c8] ss:$16 sps:$4 sm:$0xff]  }
  0xb1   : > { %1426 = vmatpush1.bf16.msra.mxu0 %v2465_v29  ;;  %1652 = vmatpush1.bf16.msra.mxu1 %v2466_v38  ;;  %v474_v29 = vadd.f32 %v2969_v57, %v388_v15  ;;  %v2496_v38 = vld [vmem:[#allocation7 + $0x28c] ss:$16 sps:$4 sm:$0xff]  }
  0xb2   : > { %1508 = vmatprep.subr.bf16.mxu0 %v2469_v39  ;;  %1734 = vmatprep.subr.bf16.mxu1 %v2472_v40  ;;  %v309_v39 = vld [vmem:[%s2936_s12 + $0x120] sm:$0xff]  ;;  %v533_v6 = vmax.f32 %v469_v50, 0.0 }
  0xb3   : > { %v2491_v40 = vld [vmem:[#allocation7 + $0x280] ss:$16 sps:$4 sm:$0xff]   ;;  %v538_v44 = vmax.f32 %v474_v29, 0.0  ;;  %v395_v59 = vmul.f32 %v2975_v0, %v309_v39  ;;  %v407_v29 = vmul.f32 %v2975_v0, %v321_v19 }
  0xb4   : > { %1428 = vmatmul.mubr.bf16.vlgmr.msra.gmra.mrb[0].mxu0 %v573_v46  ;;  %1654 = vmatmul.mubr.bf16.vlgmr.msra.gmra.mrb[0].mxu1 %v573_v46  ;;  %v396_v46 = vmul.f32 %v2965_v56, %v310_v35  ;;  %v2509_v39 = vld [vmem:[#allocation7 + $0x2e0] ss:$16 sps:$4 sm:$0xff]  }
  0xb5   : > { %1509 = vmatpush1.bf16.msra.mxu0 %v2467_v48  ;;  %1735 = vmatpush1.bf16.msra.mxu1 %v2470_v49  ;;  %v581_v48 = vpack.c.bf16 %v529_v32, %v525_v31  ;;  %v2499_v49 = vld [vmem:[#allocation7 + $0x2a4] ss:$16 sps:$4 sm:$0xff]   ;;  %v586_v1 = vpack.c.bf16 %v538_v44, %v534_v43  ;;  %v481_v11 = vadd.f32 %v2986_v12, %v395_v59  ;;  %v3065_v44 = vsub.s32 3, %v2946_v42 }
  0xb6   : > { %1510 = vmatprep.subr.bf16.mxu0 %v2475_v55  ;;  %1736 = vmatprep.subr.bf16.mxu1 %v2478_v60  ;;  %v391_v55 = vmul.f32 %v2975_v0, %v305_v36  ;;  %v314_v60 = vld [vmem:[%s2936_s12 + $0x148] sm:$0xff]  ;;  %v482_v3 = vadd.f32 %v2969_v57, %v396_v46  ;;  %v2514_v36 = vld [vmem:[#allocation7 + $0x2ec] ss:$16 sps:$4 sm:$0xff]  }
  0xb7   : > { %1437 = vmatprep.mubr.bf16.mxu0 %v578_v63  ;;  %1663 = vmatprep.mubr.bf16.mxu1 %v578_v63  ;;  %v2497_v63 = vld [vmem:[#allocation7 + $0x2a0] ss:$16 sps:$4 sm:$0xff]   ;;  %v400_v13 = vmul.f32 %v2965_v56, %v314_v60  ;;  %v2511_v31 = vld [vmem:[#allocation7 + $0x2e4] ss:$16 sps:$4 sm:$0xff]   ;;  %v545_v33 = vmax.f32 %v481_v11, 0.0 }
  0xb8   : > { %v477_v8 = vadd.f32 %v2986_v12, %v391_v55  ;;  %v546_v21 = vmax.f32 %v482_v3, 0.0  ;;  %v2517_v46 = vld [vmem:[#allocation7 + $0x304] ss:$16 sps:$4 sm:$0xff]   ;;  %v333_v3 = vld [vmem:[%s2936_s12 + $0x1e0] sm:$0xff] }
  0xb9   : > { %1511 = vmatpush1.bf16.msra.mxu0 %v2473_v61  ;;  %1737 = vmatpush1.bf16.msra.mxu1 %v2476_v62  ;;  %v318_v61 = vld [vmem:[%s2936_s12 + $0x168] sm:$0xff]  ;;  %v313_v62 = vld [vmem:[%s2936_s12 + $0x140] sm:$0xff]  ;;  %v3057_v34 = vadd.f32 %v2969_v57, %v400_v13 }
  0xba   : > { %1512 = vmatprep.subr.bf16.mxu0 %v2481_v9  ;;  %1738 = vmatprep.subr.bf16.mxu1 %v2484_v10  ;;  %v2505_v9 = vld [vmem:[#allocation7 + $0x2c4] ss:$16 sps:$4 sm:$0xff]   ;;  %v2508_v10 = vld [vmem:[#allocation7 + $0x2cc] ss:$16 sps:$4 sm:$0xff]   ;;  %v404_v14 = vmul.f32 %v2965_v56, %v318_v61  ;;  %v399_v15 = vmul.f32 %v2975_v0, %v313_v62  ;;  %v541_v32 = vmax.f32 %v477_v8, 0.0  ;;  %v419_v8 = vmul.f32 %v2975_v0, %v333_v3 }
  0xbb   : > { %v330_v59 = vld [vmem:[%s2936_s12 + $0x1c8] sm:$0xff]  ;;  %v329_v61 = vld [vmem:[%s2936_s12 + $0x1c0] sm:$0xff] }
  0xbc   : > { %1438 = vmatmul.mubr.bf16.gmra.mrb[4].mxu0 %v577_v16  ;;  %1664 = vmatmul.mubr.bf16.gmra.mrb[4].mxu1 %v577_v16  ;;  %v403_v16 = vmul.f32 %v2975_v0, %v317_v4  ;;  %v490_v35 = vadd.f32 %v2969_v57, %v404_v14  ;;  %v589_v55 = vpack.c.bf16 %v545_v33, %v541_v32  ;;  %v334_v60 = vld [vmem:[%s2936_s12 + $0x1e8] sm:$0xff]  ;;  %v2515_v4 = vld [vmem:[#allocation7 + $0x300] ss:$16 sps:$4 sm:$0xff]  }
  0xbd   : > { %1513 = vmatpush1.bf16.msra.mxu0 %v2479_v17  ;;  %1739 = vmatpush1.bf16.msra.mxu1 %v2482_v18  ;;  %v322_v17 = vld [vmem:[%s2936_s12 + $0x188] sm:$0xff]  ;;  %v420_v2 = vmul.f32 %v2965_v56, %v334_v60 }
  0xbe   : > { %1514 = vmatprep.subr.bf16.mxu0 %v2487_v23  ;;  %1740 = vmatprep.subr.bf16.mxu1 %v2490_v24  ;;  %v326_v18 = vld [vmem:[%s2936_s12 + $0x1a8] sm:$0xff]  ;;  %v408_v22 = vmul.f32 %v2965_v56, %v322_v17  ;;  %v325_v24 = vld [vmem:[%s2936_s12 + $0x1a0] sm:$0xff]  ;;  %v3088_v17 = vrot.slane %v2953_v51, %v3065_v44 }
  0xbf   : > { %1447 = vmatprep.mubr.bf16.mxu0 %v582_v27  ;;  %1673 = vmatprep.mubr.bf16.mxu1 %v582_v27  ;;  %v412_v23 = vmul.f32 %v2965_v56, %v326_v18  ;;  %v2503_v27 = vld [vmem:[#allocation7 + $0x2c0] ss:$16 sps:$4 sm:$0xff]   ;;  %v411_v30 = vmul.f32 %v2975_v0, %v325_v24  ;;  %v506_v14 = vadd.f32 %v2969_v57, %v420_v2  ;;  %v2526_v18 = vld [vmem:[#allocation7 + $0x32c] ss:$16 sps:$4 sm:$0xff]  }
  0xc1   : > { %1515 = vmatpush1.bf16.msra.mxu0 %v2485_v25  ;;  %1741 = vmatpush1.bf16.msra.mxu1 %v2488_v26  ;;  %v3052_v25 = vsub.s32 2, %v2946_v42  ;;  %v585_v26 = vpack.c.bf16 %v537_v7, %v533_v6  ;;  %v498_v43 = vadd.f32 %v2969_v57, %v412_v23  ;;  %v497_v50 = vadd.f32 %v2986_v12, %v411_v30  ;;  %v280_v30 = vld [vmem:[%s2936_s12 + $0x38] sm:$0xff] }
  0xc2   : > { %1516 = vmatprep.subr.bf16.mxu0 %v2493_v37  ;;  %1742 = vmatprep.subr.bf16.mxu1 %v2496_v38  ;;  %v485_v37 = vadd.f32 %v2986_v12, %v399_v15  ;;  %v489_v38 = vadd.f32 %v2986_v12, %v403_v16  ;;  %v550_v42 = vmax.f32 %v3057_v34, 0.0  ;;  %v415_v7 = vmul.f32 %v2975_v0, %v329_v61  ;;  %v292_v61 = vld [vmem:[%s2936_s12 + $0x98] sm:$0xff] }
  0xc3   : > { %v3071_v54 = vrot.slane %v2953_v51, %v3052_v25  ;;  %v562_v6 = vmax.f32 %v498_v43, 0.0  ;;  %v561_v11 = vmax.f32 %v497_v50, 0.0  ;;  %v505_v16 = vadd.f32 %v2986_v12, %v419_v8  ;;  %v283_v43 = vld [vmem:[%s2936_s12 + $0x50] sm:$0xff] }
  0xc4   : > { %1448 = vmatmul.mubr.bf16.gmra.mrb[8].mxu0 %v581_v48  ;;  %1674 = vmatmul.mubr.bf16.gmra.mrb[8].mxu1 %v581_v48  ;;  %v2520_v48 = vld [vmem:[#allocation7 + $0x30c] ss:$16 sps:$4 sm:$0xff]   ;;  %v549_v62 = vmax.f32 %v485_v37, 0.0  ;;  %v501_v15 = vadd.f32 %v2986_v12, %v415_v7  ;;  %v3092_v0 = vrot.slane %v2958_v52, %v3052_v25  ;;  %v570_v19 = vmax.f32 %v506_v14, 0.0  ;;  %v288_v37 = vld [vmem:[%s2936_s12 + $0x78] sm:$0xff] }
  0xc5   : > { %1517 = vmatpush1.bf16.msra.mxu0 %v2491_v40  ;;  %1743 = vmatpush1.bf16.msra.mxu1 %v2494_v41  ;;  %v590_v40 = vpack.c.bf16 %v546_v21, %v542_v20  ;;  %v494_v41 = vadd.f32 %v2969_v57, %v408_v22  ;;  %v3096_v20 = vrot.slane %v2958_v52, %v3065_v44  ;;  %v2524_v21 = vld [vmem:[#allocation7 + $0x328] ss:$16 sps:$4 sm:$0xff]   ;;  %v569_v24 = vmax.f32 %v505_v16, 0.0  ;;  %v2527_v50 = vld [vmem:[#allocation7 + $0x340] ss:$16 sps:$4 sm:$0xff]  }
  0xc6   : > { %1518 = vmatprep.subr.bf16.mxu0 %v2499_v49  ;;  %1744 = vmatprep.subr.bf16.mxu1 %v2502_v58  ;;  %v493_v49 = vadd.f32 %v2986_v12, %v407_v29  ;;  %v554_v58 = vmax.f32 %v490_v35, 0.0  ;;  %v2521_v12 = vld [vmem:[#allocation7 + $0x320] ss:$16 sps:$4 sm:$0xff]   ;;  %v565_v23 = vmax.f32 %v501_v15, 0.0  ;;  %v276_v52 = vld [vmem:[%s2936_s12 + $0x18] sm:$0xff]  ;;  %v366_v34 = vmul.f32 %v3088_v17, %v280_v30 }
  0xc7   : > { %1457 = vmatprep.mubr.bf16.mxu0 %v586_v1  ;;  %1683 = vmatprep.mubr.bf16.mxu1 %v586_v1  ;;  %v416_v1 = vmul.f32 %v2965_v56, %v330_v59  ;;  %v2523_v56 = vld [vmem:[#allocation7 + $0x324] ss:$16 sps:$4 sm:$0xff]   ;;  %v362_v33 = vmul.f32 %v3088_v17, %v276_v52  ;;  %v279_v35 = vld [vmem:[%s2936_s12 + $0x30] sm:$0xff]  ;;  %v369_v60 = vmul.f32 %v3071_v54, %v283_v43 }
  0xc8   : > { %v594_v51 = vpack.c.bf16 %v554_v58, %v550_v42  ;;  %v3107_v32 = vpack.c.bf16 %v569_v24, %v565_v23  ;;  %v378_v15 = vmul.f32 %v3088_v17, %v292_v61  ;;  %v300_v16 = vld [vmem:[%s2936_s12 + $0xd8] sm:$0xff]  ;;  %v307_v61 = vld [vmem:[%s2936_s12 + $0x110] sm:$0xff] }
  0xc9   : > { %1519 = vmatpush1.bf16.msra.mxu0 %v2497_v63  ;;  %1745 = vmatpush1.bf16.msra.mxu1 %v2500_v5  ;;  %v553_v63 = vmax.f32 %v489_v38, 0.0  ;;  %v558_v5 = vmax.f32 %v494_v41, 0.0  ;;  %v502_v13 = vadd.f32 %v2969_v57, %v416_v1  ;;  %v2532_v38 = vld [vmem:[#allocation7 + $0x34c] ss:$16 sps:$4 sm:$0xff]   ;;  %v2536_v23 = vld [vmem:[#allocation7 + $0x368] ss:$16 sps:$4 sm:$0xff]  }
  0xca   : > { %1520 = vmatprep.subr.bf16.mxu0 %v2505_v9  ;;  %1746 = vmatprep.subr.bf16.mxu1 %v2508_v10  ;;  %v2518_v9 = vld [vmem:[#allocation7 + $0x308] ss:$16 sps:$4 sm:$0xff]   ;;  %v557_v10 = vmax.f32 %v493_v49, 0.0  ;;  %v374_v49 = vmul.f32 %v3088_v17, %v288_v37  ;;  %v2541_v24 = vld [vmem:[#allocation7 + $0x384] ss:$16 sps:$4 sm:$0xff]   ;;  %v303_v37 = vld [vmem:[%s2936_s12 + $0xf0] sm:$0xff] }
  0xcb   : > { %v566_v57 = vmax.f32 %v502_v13, 0.0  ;;  %v593_v22 = vpack.c.bf16 %v553_v63, %v549_v62  ;;  %v2535_v62 = vld [vmem:[#allocation7 + $0x364] ss:$16 sps:$4 sm:$0xff]  }
  0xcc   : > { %1458 = vmatmul.mubr.bf16.gmra.mrb[12].mxu0 %v585_v26  ;;  %1684 = vmatmul.mubr.bf16.gmra.mrb[12].mxu1 %v585_v26  ;;  %v2529_v26 = vld [vmem:[#allocation7 + $0x344] ss:$16 sps:$4 sm:$0xff]   ;;  %v460_v2 = vadd.f32 %v3096_v20, %v374_v49 }
  0xcd   : > { %1521 = vmatpush1.bf16.msra.mxu0 %v2503_v27  ;;  %1747 = vmatpush1.bf16.msra.mxu1 %v2506_v28  ;;  %v3098_v27 = vpack.c.bf16 %v562_v6, %v558_v5  ;;  %v3100_v28 = vpack.c.bf16 %v561_v11, %v557_v10  ;;  %v3102_v29 = vpack.c.bf16 %v570_v19, %v566_v57  ;;  %v291_v5 = vld [vmem:[%s2936_s12 + $0x90] sm:$0xff] }
  0xce   : > { %1522 = vmatprep.subr.bf16.mxu0 %v2511_v31  ;;  %1748 = vmatprep.subr.bf16.mxu1 %v2514_v36  ;;  %v275_v31 = vld [vmem:[%s2936_s12 + $0x10] sm:$0xff]  ;;  %v284_v36 = vld [vmem:[%s2936_s12 + $0x58] sm:$0xff]  ;;  %v455_v10 = vadd.f32 %v3092_v0, %v369_v60  ;;  %v524_v14 = vmax.f32 %v460_v2, 0.0 }
  0xcf   : > { %1467 = vmatprep.mubr.bf16.mxu0 %v590_v40  ;;  %1693 = vmatprep.mubr.bf16.mxu1 %v590_v40  ;;  %v365_v40 = vmul.f32 %v3071_v54, %v279_v35  ;;  %v370_v41 = vmul.f32 %v3088_v17, %v284_v36  ;;  %v2538_v6 = vld [vmem:[#allocation7 + $0x36c] ss:$16 sps:$4 sm:$0xff]   ;;  %v386_v36 = vmul.f32 %v3088_v17, %v300_v16 }
  0xd0   : > { %v295_v11 = vld [vmem:[%s2936_s12 + $0xb0] sm:$0xff]  ;;  %v519_v19 = vmax.f32 %v455_v10, 0.0  ;;  %v393_v16 = vmul.f32 %v3071_v54, %v307_v61 }
  0xd1   : > { %1523 = vmatpush1.bf16.msra.mxu0 %v2509_v39  ;;  %1749 = vmatpush1.bf16.msra.mxu1 %v2512_v45  ;;  %v361_v39 = vmul.f32 %v3071_v54, %v275_v31  ;;  %v287_v45 = vld [vmem:[%s2936_s12 + $0x70] sm:$0xff]  ;;  %v451_v58 = vadd.f32 %v3092_v0, %v365_v40  ;;  %v456_v59 = vadd.f32 %v3096_v20, %v370_v41 }
  0xd2   : > { %1524 = vmatprep.subr.bf16.mxu0 %v2517_v46  ;;  %1750 = vmatprep.subr.bf16.mxu1 %v2520_v48  ;;  %v448_v46 = vadd.f32 %v3096_v20, %v362_v33  ;;  %v452_v48 = vadd.f32 %v3096_v20, %v366_v34  ;;  %v373_v3 = vmul.f32 %v3071_v54, %v287_v45  ;;  %v299_v31 = vld [vmem:[%s2936_s12 + $0xd0] sm:$0xff]  ;;  %v312_v45 = vld [vmem:[%s2936_s12 + $0x138] sm:$0xff] }
  0xd3   : > { %v447_v42 = vadd.f32 %v3092_v0, %v361_v39  ;;  %v515_v8 = vmax.f32 %v451_v58, 0.0  ;;  %v381_v30 = vmul.f32 %v3071_v54, %v295_v11  ;;  %v2544_v33 = vld [vmem:[#allocation7 + $0x38c] ss:$16 sps:$4 sm:$0xff]   ;;  %v320_v11 = vld [vmem:[%s2936_s12 + $0x178] sm:$0xff] }
  0xd4   : > { %1468 = vmatmul.mubr.bf16.gmra.mrb[16].mxu0 %v589_v55  ;;  %1694 = vmatmul.mubr.bf16.gmra.mrb[16].mxu1 %v589_v55  ;;  %v2530_v55 = vld [vmem:[#allocation7 + $0x348] ss:$16 sps:$4 sm:$0xff]   ;;  %v512_v63 = vmax.f32 %v448_v46, 0.0  ;;  %v516_v1 = vmax.f32 %v452_v48, 0.0  ;;  %v2539_v46 = vld [vmem:[#allocation7 + $0x380] ss:$16 sps:$4 sm:$0xff]  }
  0xd5   : > { %1525 = vmatpush1.bf16.msra.mxu0 %v2515_v4  ;;  %1751 = vmatpush1.bf16.msra.mxu1 %v2518_v9  ;;  %v296_v4 = vld [vmem:[%s2936_s12 + $0xb8] sm:$0xff]  ;;  %v511_v7 = vmax.f32 %v447_v42, 0.0  ;;  %v520_v9 = vmax.f32 %v456_v59, 0.0  ;;  %v467_v41 = vadd.f32 %v3092_v0, %v381_v30  ;;  %v389_v59 = vmul.f32 %v3071_v54, %v303_v37 }
  0xd6   : > { %1526 = vmatprep.subr.bf16.mxu0 %v2523_v56  ;;  %1752 = vmatprep.subr.bf16.mxu1 %v2526_v18  ;;  %v3133_v13 = vpack.c.bf16 %v516_v1, %v512_v63  ;;  %v459_v56 = vadd.f32 %v3092_v0, %v373_v3  ;;  %v2533_v18 = vld [vmem:[#allocation7 + $0x360] ss:$16 sps:$4 sm:$0xff]   ;;  %v2547_v63 = vld [vmem:[#allocation7 + $0x3a4] ss:$16 sps:$4 sm:$0xff]   ;;  %v2550_v1 = vld [vmem:[#allocation7 + $0x3ac] ss:$16 sps:$4 sm:$0xff]   ;;  %v479_v30 = vadd.f32 %v3092_v0, %v393_v16 }
  0xd7   : > { %1477 = vmatprep.mubr.bf16.mxu0 %v594_v51  ;;  %1703 = vmatprep.mubr.bf16.mxu1 %v594_v51  ;;  %v3138_v57 = vpack.c.bf16 %v515_v8, %v511_v7  ;;  %v304_v51 = vld [vmem:[%s2936_s12 + $0xf8] sm:$0xff]  ;;  %v531_v42 = vmax.f32 %v467_v41, 0.0  ;;  %v323_v41 = vld [vmem:[%s2936_s12 + $0x190] sm:$0xff] }
  0xd8   : > { %v523_v52 = vmax.f32 %v459_v56, 0.0  ;;  %v390_v43 = vmul.f32 %v3088_v17, %v304_v51  ;;  %v2557_v16 = vld [vmem:[#allocation7 + $0x3e0] ss:$16 sps:$4 sm:$0xff]  }
  0xd9   : > { %1527 = vmatpush1.bf16.msra.mxu0 %v2521_v12  ;;  %1753 = vmatpush1.bf16.msra.mxu1 %v2524_v21  ;;  %v382_v12 = vmul.f32 %v3088_v17, %v296_v4  ;;  %v377_v21 = vmul.f32 %v3071_v54, %v291_v5  ;;  %v398_v5 = vmul.f32 %v3088_v17, %v312_v45  ;;  %v543_v45 = vmax.f32 %v479_v30, 0.0 }
  0xda   : > { %1528 = vmatprep.subr.bf16.mxu0 %v2529_v26  ;;  %1754 = vmatprep.subr.bf16.mxu1 %v2532_v38  ;;  %v3143_v26 = vpack.c.bf16 %v524_v14, %v520_v9  ;;  %v308_v38 = vld [vmem:[%s2936_s12 + $0x118] sm:$0xff]  ;;  %v3155_v39 = vpack.c.bf16 %v523_v52, %v519_v19  ;;  %v476_v58 = vadd.f32 %v3096_v20, %v390_v43  ;;  %v2545_v14 = vld [vmem:[#allocation7 + $0x3a0] ss:$16 sps:$4 sm:$0xff]   ;;  %v2556_v52 = vld [vmem:[#allocation7 + $0x3cc] ss:$16 sps:$4 sm:$0xff]  }
  0xdb   : > { %v468_v34 = vadd.f32 %v3096_v20, %v382_v12  ;;  %v463_v35 = vadd.f32 %v3092_v0, %v377_v21  ;;  %v394_v60 = vmul.f32 %v3088_v17, %v308_v38  ;;  %v475_v9 = vadd.f32 %v3092_v0, %v389_v59  ;;  %v315_v19 = vld [vmem:[%s2936_s12 + $0x150] sm:$0xff]  ;;  %v2548_v12 = vld [vmem:[#allocation7 + $0x3a8] ss:$16 sps:$4 sm:$0xff]   ;;  %v2553_v21 = vld [vmem:[#allocation7 + $0x3c4] ss:$16 sps:$4 sm:$0xff]  }
  0xdc   : > { %1478 = vmatmul.mubr.bf16.gmra.mrb[20].mxu0 %v593_v22  ;;  %1704 = vmatmul.mubr.bf16.gmra.mrb[20].mxu1 %v593_v22  ;;  %v464_v22 = vadd.f32 %v3096_v20, %v378_v15  ;;  %v540_v8 = vmax.f32 %v476_v58, 0.0  ;;  %v484_v15 = vadd.f32 %v3096_v20, %v398_v5  ;;  %v401_v38 = vmul.f32 %v3071_v54, %v315_v19  ;;  %v2559_v59 = vld [vmem:[#allocation7 + $0x3e4] ss:$16 sps:$4 sm:$0xff]  }
  0xdd   : > { %1529 = vmatpush1.bf16.msra.mxu0 %v2527_v50  ;;  %1755 = vmatpush1.bf16.msra.mxu1 %v2530_v55  ;;  %v532_v48 = vmax.f32 %v468_v34, 0.0  ;;  %v527_v49 = vmax.f32 %v463_v35, 0.0  ;;  %v472_v50 = vadd.f32 %v3096_v20, %v386_v36  ;;  %v385_v55 = vmul.f32 %v3071_v54, %v299_v31  ;;  %v319_v34 = vld [vmem:[%s2936_s12 + $0x170] sm:$0xff]  ;;  %v324_v35 = vld [vmem:[%s2936_s12 + $0x198] sm:$0xff] }
  0xde   : > { %1530 = vmatprep.subr.bf16.mxu0 %v2535_v62  ;;  %1756 = vmatprep.subr.bf16.mxu1 %v2538_v6  ;;  %v528_v40 = vmax.f32 %v464_v22, 0.0  ;;  %v311_v62 = vld [vmem:[%s2936_s12 + $0x130] sm:$0xff]  ;;  %v316_v6 = vld [vmem:[%s2936_s12 + $0x158] sm:$0xff]  ;;  %v480_v10 = vadd.f32 %v3096_v20, %v394_v60  ;;  %v548_v22 = vmax.f32 %v484_v15, 0.0  ;;  %v410_v58 = vmul.f32 %v3088_v17, %v324_v35 }
  0xdf   : > { %1487 = vmatprep.mubr.bf16.mxu0 %v3098_v27  ;;  %1713 = vmatprep.mubr.bf16.mxu1 %v3098_v27  ;;  %v2542_v27 = vld [vmem:[#allocation7 + $0x388] ss:$16 sps:$4 sm:$0xff]   ;;  %v536_v3 = vmax.f32 %v472_v50, 0.0  ;;  %v471_v4 = vadd.f32 %v3092_v0, %v385_v55  ;;  %v3172_v7 = vpack.c.bf16 %v531_v42, %v527_v49  ;;  %v327_v49 = vld [vmem:[%s2936_s12 + $0x1b0] sm:$0xff]  ;;  %v487_v42 = vadd.f32 %v3092_v0, %v401_v38 }
  0xe0   : > { %v3167_v2 = vpack.c.bf16 %v532_v48, %v528_v40  ;;  %v328_v40 = vld [vmem:[%s2936_s12 + $0x1b8] sm:$0xff]  ;;  %v2551_v50 = vld [vmem:[#allocation7 + $0x3c0] ss:$16 sps:$4 sm:$0xff]   ;;  %v2562_v60 = vld [vmem:[#allocation7 + $0x3ec] ss:$16 sps:$4 sm:$0xff]  }
  0xe1   : > { %1531 = vmatpush1.bf16.msra.mxu0 %v2533_v18  ;;  %1757 = vmatpush1.bf16.msra.mxu1 %v2536_v23  ;;  %v535_v56 = vmax.f32 %v471_v4, 0.0  ;;  %v397_v18 = vmul.f32 %v3071_v54, %v311_v62  ;;  %v3183_v51 = vpack.c.bf16 %v540_v8, %v536_v3  ;;  %v539_v23 = vmax.f32 %v475_v9, 0.0  ;;  %v332_v3 = vld [vmem:[%s2936_s12 + $0x1d8] sm:$0xff]  ;;  %v335_v15 = vld [vmem:[%s2936_s12 + $0x1f0] sm:$0xff] }
  0xe2   : > { %1532 = vmatprep.subr.bf16.mxu0 %v2541_v24  ;;  %1758 = vmatprep.subr.bf16.mxu1 %v2544_v33  ;;  %v544_v24 = vmax.f32 %v480_v10, 0.0  ;;  %v406_v33 = vmul.f32 %v3088_v17, %v320_v11  ;;  %v551_v5 = vmax.f32 %v487_v42, 0.0  ;;  %v413_v8 = vmul.f32 %v3071_v54, %v327_v49  ;;  %v336_v9 = vld [vmem:[%s2936_s12 + $0x1f8] sm:$0xff]  ;;  %v331_v10 = vld [vmem:[%s2936_s12 + $0x1d0] sm:$0xff] }
  0xe3   : > { %v483_v31 = vadd.f32 %v3092_v0, %v397_v18  ;;  %v3193_v36 = vpack.c.bf16 %v539_v23, %v535_v56  ;;  %v2560_v18 = vld [vmem:[#allocation7 + $0x3e8] ss:$16 sps:$4 sm:$0xff]   ;;  %v418_v23 = vmul.f32 %v3088_v17, %v332_v3 }
  0xe4   : > { %1488 = vmatmul.mubr.bf16.gmra.mrb[24].mxu0 %v3100_v28  ;;  %1714 = vmatmul.mubr.bf16.gmra.mrb[24].mxu1 %v3100_v28  ;;  %v402_v28 = vmul.f32 %v3088_v17, %v316_v6  ;;  %v3199_v43 = vpack.c.bf16 %v548_v22, %v544_v24  ;;  %v492_v48 = vadd.f32 %v3096_v20, %v406_v33 }
  0xe5   : > { %1533 = vmatpush1.bf16.msra.mxu0 %v2539_v46  ;;  %1759 = vmatpush1.bf16.msra.mxu1 %v2542_v27  ;;  %v547_v46 = vmax.f32 %v483_v31, 0.0  ;;  %v405_v27 = vmul.f32 %v3071_v54, %v319_v34  ;;  %v496_v6 = vadd.f32 %v3096_v20, %v410_v58  ;;  %v504_v31 = vadd.f32 %v3096_v20, %v418_v23 }
  0xe6   : > { %1534 = vmatprep.subr.bf16.mxu0 %v2547_v63  ;;  %1760 = vmatprep.subr.bf16.mxu1 %v2550_v1  ;;  %v488_v37 = vadd.f32 %v3096_v20, %v402_v28  ;;  %v556_v62 = vmax.f32 %v492_v48, 0.0  ;;  %v414_v63 = vmul.f32 %v3088_v17, %v328_v40  ;;  %v409_v1 = vmul.f32 %v3071_v54, %v323_v41 }
  0xe7   : > { %1497 = vmatprep.mubr.bf16.mxu0 %v3102_v29  ;;  %1723 = vmatprep.mubr.bf16.mxu1 %v3102_v29  ;;  %v2554_v29 = vld [vmem:[#allocation7 + $0x3c8] ss:$16 sps:$4 sm:$0xff]   ;;  %v3206_v61 = vpack.c.bf16 %v547_v46, %v543_v45  ;;  %v491_v4 = vadd.f32 %v3092_v0, %v405_v27  ;;  %v422_v28 = vmul.f32 %v3088_v17, %v336_v9  ;;  %v568_v38 = vmax.f32 %v504_v31, 0.0 }
  0xe8   : > { %v552_v55 = vmax.f32 %v488_v37, 0.0  ;;  %v495_v56 = vadd.f32 %v3092_v0, %v409_v1  ;;  %v421_v33 = vmul.f32 %v3071_v54, %v335_v15 }
  0xe9   : > { %1535 = vmatpush1.bf16.msra.mxu0 %v2545_v14  ;;  %1761 = vmatpush1.bf16.msra.mxu1 %v2548_v12  ;;  %v500_v14 = vadd.f32 %v3096_v20, %v414_v63  ;;  %v555_v19 = vmax.f32 %v491_v4, 0.0  ;;  %v560_v12 = vmax.f32 %v496_v6, 0.0  ;;  %v508_v35 = vadd.f32 %v3096_v20, %v422_v28 }
  0xea   : > { %1536 = vmatprep.subr.bf16.mxu0 %v2553_v21  ;;  %1762 = vmatprep.subr.bf16.mxu1 %v2556_v52  ;;  %v596_v11 = vpack.c.bf16 %v556_v62, %v552_v55  ;;  %v499_v21 = vadd.f32 %v3092_v0, %v413_v8  ;;  %v417_v52 = vmul.f32 %v3071_v54, %v331_v10 }
  0xeb   : > { %v564_v24 = vmax.f32 %v500_v14, 0.0  ;;  %v595_v22 = vpack.c.bf16 %v555_v19, %v551_v5  ;;  %v507_v40 = vadd.f32 %v3092_v0, %v421_v33  ;;  %v572_v41 = vmax.f32 %v508_v35, 0.0 }
  0xec   : > { %1498 = vmatmul.mubr.bf16.gmra.mrb[28].mxu0 %v3107_v32  ;;  %1724 = vmatmul.mubr.bf16.gmra.mrb[28].mxu1 %v3107_v32  ;;  %v559_v32 = vmax.f32 %v495_v56, 0.0  ;;  %v563_v30 = vmax.f32 %v499_v21, 0.0  ;;  %v503_v37 = vadd.f32 %v3092_v0, %v417_v52  ;;  %v733_v0 = vld [vmem:[%s3452_s4] sm:$0xf] }
  0xed   : > { %1537 = vmatpush1.bf16.msra.mxu0 %v2551_v50  ;;  %1763 = vmatpush1.bf16.msra.mxu1 %v2554_v29  ;;  %v600_v34 = vpack.c.bf16 %v564_v24, %v560_v12  ;;  %v604_v46 = vpack.c.bf16 %v572_v41, %v568_v38  ;;  %v3254_v20 = vrot.slane %v733_v0, %v2961_v53 }
  0xee   : > { %1538 = vmatprep.subr.bf16.mxu0 %v2559_v59  ;;  %1764 = vmatprep.subr.bf16.mxu1 %v2562_v60  ;;  %v599_v17 = vpack.c.bf16 %v563_v30, %v559_v32  ;;  %v567_v45 = vmax.f32 %v503_v37, 0.0 }
  0xef   : > { %1540 = vmatprep.mubr.bf16.mxu0 %v3133_v13  ;;  %1766 = vmatprep.mubr.bf16.mxu1 %v3133_v13  ;;  %v571_v13 = vmax.f32 %v507_v40, 0.0 }
  0xf1   : > { %1539 = vmatpush1.bf16.msra.mxu0 %v2557_v16  ;;  %1765 = vmatpush1.bf16.msra.mxu1 %v2560_v18  ;;  %v603_v54 = vpack.c.bf16 %v571_v13, %v567_v45 }
  0xf4   : > { %1541 = vmatmul.mubr.bf16.vlgmr.msra.gmra.mrb[0].mxu0 %v3138_v57  ;;  %1767 = vmatmul.mubr.bf16.vlgmr.msra.gmra.mrb[0].mxu1 %v3138_v57  ;;  %v3257_v57 = vrot.slane %v733_v0, %v3052_v25 }
  0xf5   : > { %1550 = vmatprep.mubr.bf16.mxu0 %v3143_v26  ;;  %1776 = vmatprep.mubr.bf16.mxu1 %v3143_v26  ;;  %v3260_v26 = vrot.slane %v733_v0, %v2949_v47 }
  0xfc   : > { %1551 = vmatmul.mubr.bf16.gmra.mrb[4].mxu0 %v3155_v39  ;;  %1777 = vmatmul.mubr.bf16.gmra.mrb[4].mxu1 %v3155_v39  ;;  %v3263_v39 = vrot.slane %v733_v0, %v3065_v44 }
  0xfd   : > { %1560 = vmatprep.mubr.bf16.mxu0 %v3167_v2  ;;  %1786 = vmatprep.mubr.bf16.mxu1 %v3167_v2 }
 0x104   : > { %1561 = vmatmul.mubr.bf16.gmra.mrb[8].mxu0 %v3172_v7  ;;  %1787 = vmatmul.mubr.bf16.gmra.mrb[8].mxu1 %v3172_v7 }
 0x105   : > { %1570 = vmatprep.mubr.bf16.mxu0 %v3183_v51  ;;  %1796 = vmatprep.mubr.bf16.mxu1 %v3183_v51 }
 0x10c   : > { %1571 = vmatmul.mubr.bf16.gmra.mrb[12].mxu0 %v3193_v36  ;;  %1797 = vmatmul.mubr.bf16.gmra.mrb[12].mxu1 %v3193_v36 }
 0x10d   : > { %1580 = vmatprep.mubr.bf16.mxu0 %v3199_v43  ;;  %1806 = vmatprep.mubr.bf16.mxu1 %v3199_v43 }
 0x114   : > { %1581 = vmatmul.mubr.bf16.gmra.mrb[16].mxu0 %v3206_v61  ;;  %1807 = vmatmul.mubr.bf16.gmra.mrb[16].mxu1 %v3206_v61 }
 0x115   : > { %1590 = vmatprep.mubr.bf16.mxu0 %v596_v11  ;;  %1816 = vmatprep.mubr.bf16.mxu1 %v596_v11 }
 0x11c   : > { %1591 = vmatmul.mubr.bf16.gmra.mrb[20].mxu0 %v595_v22  ;;  %1817 = vmatmul.mubr.bf16.gmra.mrb[20].mxu1 %v595_v22 }
 0x11d   : > { %1600 = vmatprep.mubr.bf16.mxu0 %v600_v34  ;;  %1826 = vmatprep.mubr.bf16.mxu1 %v600_v34 }
 0x124   : > { %1601 = vmatmul.mubr.bf16.gmra.mrb[24].mxu0 %v599_v17  ;;  %1827 = vmatmul.mubr.bf16.gmra.mrb[24].mxu1 %v599_v17 }
 0x125   : > { %1610 = vmatprep.mubr.bf16.mxu0 %v604_v46  ;;  %1836 = vmatprep.mubr.bf16.mxu1 %v604_v46 }
 0x12c   : > { %1611 = vmatmul.mubr.bf16.gmra.mrb[28].mxu0 %v603_v54  ;;  %1837 = vmatmul.mubr.bf16.gmra.mrb[28].mxu1 %v603_v54 }
 0x1c7   : > { %v1542_v2 = vpop.f32.mrb[0].mxu0  ;;  %v1768_v7 = vpop.f32.mrb[0].mxu1 }
 0x1c8   : > { %v2170_v51 = vadd.f32 %v1542_v2, %v3254_v20  ;;  %v2202_v36 = vadd.f32 %v1768_v7, %v3257_v57  ;;  %v1544_v43 = vpop.f32.mrb[1].mxu0  ;;  %v1770_v48 = vpop.f32.mrb[1].mxu1 }
 0x1c9   : > { %v2171_v53 = vadd.f32 %v1544_v43, %v3260_v26  ;;  %v2203_v49 = vadd.f32 %v1770_v48, %v3263_v39  ;;  %v1546_v25 = vpop.f32.mrb[2].mxu0  ;;  %v1772_v50 = vpop.f32.mrb[2].mxu1 }
 0x1ca   : > { %1847 = vst [vmem:[%s3271_s28] sm:$0xff] %v2170_v51  ;;  %1849 = vst [vmem:[%s3271_s28 + $0x10] sm:$0xff] %v2202_v36  ;;  %v2172_v47 = vadd.f32 %v1546_v25, %v3254_v20  ;;  %v2204_v44 = vadd.f32 %v1772_v50, %v3257_v57  ;;  %v1548_v29 = vpop.f32.mrb[3].mxu0  ;;  %v1774_v55 = vpop.f32.mrb[3].mxu1 }
 0x1cb   : > { %1848 = vst [vmem:[%s3271_s28 + $0x8] sm:$0xff] %v2171_v53  ;;  %1850 = vst [vmem:[%s3271_s28 + $0x18] sm:$0xff] %v2203_v49  ;;  %v2173_v27 = vadd.f32 %v1548_v29, %v3260_v26  ;;  %v2205_v42 = vadd.f32 %v1774_v55, %v3263_v39 }
 0x1cc   : > { %1851 = vst [vmem:[%s3271_s28 + $0x20] sm:$0xff] %v2172_v47  ;;  %1853 = vst [vmem:[%s3271_s28 + $0x30] sm:$0xff] %v2204_v44 }
 0x1cd   : > { %1852 = vst [vmem:[%s3271_s28 + $0x28] sm:$0xff] %v2173_v27  ;;  %1854 = vst [vmem:[%s3271_s28 + $0x38] sm:$0xff] %v2205_v42 }
 0x1cf   : > { %v1552_v58 = vpop.f32.mrb[4].mxu0  ;;  %v1778_v59 = vpop.f32.mrb[4].mxu1 }
 0x1d0   : > { %v2174_v60 = vadd.f32 %v1552_v58, %v3254_v20  ;;  %v2206_v61 = vadd.f32 %v1778_v59, %v3257_v57  ;;  %v1554_v62 = vpop.f32.mrb[5].mxu0  ;;  %v1780_v63 = vpop.f32.mrb[5].mxu1 }
 0x1d1   : > { %v2175_v1 = vadd.f32 %v1554_v62, %v3260_v26  ;;  %v2207_v3 = vadd.f32 %v1780_v63, %v3263_v39  ;;  %v1556_v4 = vpop.f32.mrb[6].mxu0  ;;  %v1782_v5 = vpop.f32.mrb[6].mxu1 }
 0x1d2   : > { %1855 = vst [vmem:[%s3271_s28 + $0x40] sm:$0xff] %v2174_v60  ;;  %1857 = vst [vmem:[%s3271_s28 + $0x50] sm:$0xff] %v2206_v61  ;;  %v2176_v6 = vadd.f32 %v1556_v4, %v3254_v20  ;;  %v2208_v8 = vadd.f32 %v1782_v5, %v3257_v57  ;;  %v1558_v9 = vpop.f32.mrb[7].mxu0  ;;  %v1784_v10 = vpop.f32.mrb[7].mxu1 }
 0x1d3   : > { %1856 = vst [vmem:[%s3271_s28 + $0x48] sm:$0xff] %v2175_v1  ;;  %1858 = vst [vmem:[%s3271_s28 + $0x58] sm:$0xff] %v2207_v3  ;;  %v2177_v11 = vadd.f32 %v1558_v9, %v3260_v26  ;;  %v2209_v14 = vadd.f32 %v1784_v10, %v3263_v39 }
 0x1d4   : > { %1859 = vst [vmem:[%s3271_s28 + $0x60] sm:$0xff] %v2176_v6  ;;  %1861 = vst [vmem:[%s3271_s28 + $0x70] sm:$0xff] %v2208_v8 }
 0x1d5   : > { %1860 = vst [vmem:[%s3271_s28 + $0x68] sm:$0xff] %v2177_v11  ;;  %1862 = vst [vmem:[%s3271_s28 + $0x78] sm:$0xff] %v2209_v14 }
 0x1d7   : > { %v1562_v56 = vpop.f32.mrb[8].mxu0  ;;  %v1788_v15 = vpop.f32.mrb[8].mxu1 }
 0x1d8   : > { %v2178_v16 = vadd.f32 %v1562_v56, %v3254_v20  ;;  %v2210_v18 = vadd.f32 %v1788_v15, %v3257_v57  ;;  %v1564_v19 = vpop.f32.mrb[9].mxu0  ;;  %v1790_v12 = vpop.f32.mrb[9].mxu1 }
 0x1d9   : > { %v2179_v21 = vadd.f32 %v1564_v19, %v3260_v26  ;;  %v2211_v23 = vadd.f32 %v1790_v12, %v3263_v39  ;;  %v1566_v24 = vpop.f32.mrb[10].mxu0  ;;  %v1792_v32 = vpop.f32.mrb[10].mxu1 }
 0x1da   : > { %1863 = vst [vmem:[%s3271_s28 + $0x80] sm:$0xff] %v2178_v16  ;;  %1865 = vst [vmem:[%s3271_s28 + $0x90] sm:$0xff] %v2210_v18  ;;  %v2180_v28 = vadd.f32 %v1566_v24, %v3254_v20  ;;  %v2212_v52 = vadd.f32 %v1792_v32, %v3257_v57  ;;  %v1568_v22 = vpop.f32.mrb[11].mxu0  ;;  %v1794_v30 = vpop.f32.mrb[11].mxu1 }
 0x1db   : > { %1864 = vst [vmem:[%s3271_s28 + $0x88] sm:$0xff] %v2179_v21  ;;  %1866 = vst [vmem:[%s3271_s28 + $0x98] sm:$0xff] %v2211_v23  ;;  %v2181_v31 = vadd.f32 %v1568_v22, %v3260_v26  ;;  %v2213_v33 = vadd.f32 %v1794_v30, %v3263_v39 }
 0x1dc   : > { %1867 = vst [vmem:[%s3271_s28 + $0xa0] sm:$0xff] %v2180_v28  ;;  %1869 = vst [vmem:[%s3271_s28 + $0xb0] sm:$0xff] %v2212_v52 }
 0x1dd   : > { %1868 = vst [vmem:[%s3271_s28 + $0xa8] sm:$0xff] %v2181_v31  ;;  %1870 = vst [vmem:[%s3271_s28 + $0xb8] sm:$0xff] %v2213_v33 }
 0x1df   : > { %v1572_v34 = vpop.f32.mrb[12].mxu0  ;;  %v1798_v35 = vpop.f32.mrb[12].mxu1 }
 0x1e0   : > { %v2182_v37 = vadd.f32 %v1572_v34, %v3254_v20  ;;  %v2214_v17 = vadd.f32 %v1798_v35, %v3257_v57  ;;  %v1574_v38 = vpop.f32.mrb[13].mxu0  ;;  %v1800_v40 = vpop.f32.mrb[13].mxu1 }
 0x1e1   : > { %v2183_v41 = vadd.f32 %v1574_v38, %v3260_v26  ;;  %v2215_v45 = vadd.f32 %v1800_v40, %v3263_v39  ;;  %v1576_v13 = vpop.f32.mrb[14].mxu0  ;;  %v1802_v46 = vpop.f32.mrb[14].mxu1 }
 0x1e2   : > { %1871 = vst [vmem:[%s3271_s28 + $0xc0] sm:$0xff] %v2182_v37  ;;  %1873 = vst [vmem:[%s3271_s28 + $0xd0] sm:$0xff] %v2214_v17  ;;  %v2184_v54 = vadd.f32 %v1576_v13, %v3254_v20  ;;  %v2216_v0 = vadd.f32 %v1802_v46, %v3257_v57  ;;  %v1578_v2 = vpop.f32.mrb[15].mxu0  ;;  %v1804_v7 = vpop.f32.mrb[15].mxu1 }
 0x1e3   : > { %1872 = vst [vmem:[%s3271_s28 + $0xc8] sm:$0xff] %v2183_v41  ;;  %1874 = vst [vmem:[%s3271_s28 + $0xd8] sm:$0xff] %v2215_v45  ;;  %v2185_v51 = vadd.f32 %v1578_v2, %v3260_v26  ;;  %v2217_v36 = vadd.f32 %v1804_v7, %v3263_v39 }
 0x1e4   : > { %1875 = vst [vmem:[%s3271_s28 + $0xe0] sm:$0xff] %v2184_v54  ;;  %1877 = vst [vmem:[%s3271_s28 + $0xf0] sm:$0xff] %v2216_v0 }
 0x1e5   : > { %1876 = vst [vmem:[%s3271_s28 + $0xe8] sm:$0xff] %v2185_v51  ;;  %1878 = vst [vmem:[%s3271_s28 + $0xf8] sm:$0xff] %v2217_v36 }
 0x1e7   : > { %v1582_v43 = vpop.f32.mrb[16].mxu0  ;;  %v1808_v48 = vpop.f32.mrb[16].mxu1 }
 0x1e8   : > { %v2186_v53 = vadd.f32 %v1582_v43, %v3254_v20  ;;  %v2218_v49 = vadd.f32 %v1808_v48, %v3257_v57  ;;  %v1584_v25 = vpop.f32.mrb[17].mxu0  ;;  %v1810_v50 = vpop.f32.mrb[17].mxu1 }
 0x1e9   : > { %v2187_v47 = vadd.f32 %v1584_v25, %v3260_v26  ;;  %v2219_v44 = vadd.f32 %v1810_v50, %v3263_v39  ;;  %v1586_v29 = vpop.f32.mrb[18].mxu0  ;;  %v1812_v55 = vpop.f32.mrb[18].mxu1 }
 0x1ea   : > { %1879 = vst [vmem:[%s3271_s28 + $0x100] sm:$0xff] %v2186_v53  ;;  %1881 = vst [vmem:[%s3271_s28 + $0x110] sm:$0xff] %v2218_v49  ;;  %v2188_v27 = vadd.f32 %v1586_v29, %v3254_v20  ;;  %v2220_v42 = vadd.f32 %v1812_v55, %v3257_v57  ;;  %v1588_v58 = vpop.f32.mrb[19].mxu0  ;;  %v1814_v59 = vpop.f32.mrb[19].mxu1 }
 0x1eb   : > { %1880 = vst [vmem:[%s3271_s28 + $0x108] sm:$0xff] %v2187_v47  ;;  %1882 = vst [vmem:[%s3271_s28 + $0x118] sm:$0xff] %v2219_v44  ;;  %v2189_v60 = vadd.f32 %v1588_v58, %v3260_v26  ;;  %v2221_v61 = vadd.f32 %v1814_v59, %v3263_v39 }
 0x1ec   : > { %1883 = vst [vmem:[%s3271_s28 + $0x120] sm:$0xff] %v2188_v27  ;;  %1885 = vst [vmem:[%s3271_s28 + $0x130] sm:$0xff] %v2220_v42 }
 0x1ed   : > { %1884 = vst [vmem:[%s3271_s28 + $0x128] sm:$0xff] %v2189_v60  ;;  %1886 = vst [vmem:[%s3271_s28 + $0x138] sm:$0xff] %v2221_v61 }
 0x1ef   : > { %v1592_v62 = vpop.f32.mrb[20].mxu0  ;;  %v1818_v63 = vpop.f32.mrb[20].mxu1 }
 0x1f0   : > { %v2190_v1 = vadd.f32 %v1592_v62, %v3254_v20  ;;  %v2222_v3 = vadd.f32 %v1818_v63, %v3257_v57  ;;  %v1594_v4 = vpop.f32.mrb[21].mxu0  ;;  %v1820_v5 = vpop.f32.mrb[21].mxu1 }
 0x1f1   : > { %v2191_v6 = vadd.f32 %v1594_v4, %v3260_v26  ;;  %v2223_v8 = vadd.f32 %v1820_v5, %v3263_v39  ;;  %v1596_v9 = vpop.f32.mrb[22].mxu0  ;;  %v1822_v10 = vpop.f32.mrb[22].mxu1 }
 0x1f2   : > { %1887 = vst [vmem:[%s3271_s28 + $0x140] sm:$0xff] %v2190_v1  ;;  %1889 = vst [vmem:[%s3271_s28 + $0x150] sm:$0xff] %v2222_v3  ;;  %v2192_v11 = vadd.f32 %v1596_v9, %v3254_v20  ;;  %v2224_v14 = vadd.f32 %v1822_v10, %v3257_v57  ;;  %v1598_v56 = vpop.f32.mrb[23].mxu0  ;;  %v1824_v15 = vpop.f32.mrb[23].mxu1 }
 0x1f3   : > { %1888 = vst [vmem:[%s3271_s28 + $0x148] sm:$0xff] %v2191_v6  ;;  %1890 = vst [vmem:[%s3271_s28 + $0x158] sm:$0xff] %v2223_v8  ;;  %v2193_v16 = vadd.f32 %v1598_v56, %v3260_v26  ;;  %v2225_v18 = vadd.f32 %v1824_v15, %v3263_v39 }
 0x1f4   : > { %1891 = vst [vmem:[%s3271_s28 + $0x160] sm:$0xff] %v2192_v11  ;;  %1893 = vst [vmem:[%s3271_s28 + $0x170] sm:$0xff] %v2224_v14 }
 0x1f5   : > { %1892 = vst [vmem:[%s3271_s28 + $0x168] sm:$0xff] %v2193_v16  ;;  %1894 = vst [vmem:[%s3271_s28 + $0x178] sm:$0xff] %v2225_v18 }
 0x1f7   : > { %v1602_v19 = vpop.f32.mrb[24].mxu0  ;;  %v1828_v12 = vpop.f32.mrb[24].mxu1 }
 0x1f8   : > { %v2194_v21 = vadd.f32 %v1602_v19, %v3254_v20  ;;  %v2226_v23 = vadd.f32 %v1828_v12, %v3257_v57  ;;  %v1604_v24 = vpop.f32.mrb[25].mxu0  ;;  %v1830_v32 = vpop.f32.mrb[25].mxu1 }
 0x1f9   : > { %v2195_v28 = vadd.f32 %v1604_v24, %v3260_v26  ;;  %v2227_v52 = vadd.f32 %v1830_v32, %v3263_v39  ;;  %v1606_v22 = vpop.f32.mrb[26].mxu0  ;;  %v1832_v30 = vpop.f32.mrb[26].mxu1 }
 0x1fa   : > { %1895 = vst [vmem:[%s3271_s28 + $0x180] sm:$0xff] %v2194_v21  ;;  %1897 = vst [vmem:[%s3271_s28 + $0x190] sm:$0xff] %v2226_v23  ;;  %v2196_v31 = vadd.f32 %v1606_v22, %v3254_v20  ;;  %v2228_v33 = vadd.f32 %v1832_v30, %v3257_v57  ;;  %v1608_v34 = vpop.f32.mrb[27].mxu0  ;;  %v1834_v35 = vpop.f32.mrb[27].mxu1 }
 0x1fb   : > { %1896 = vst [vmem:[%s3271_s28 + $0x188] sm:$0xff] %v2195_v28  ;;  %1898 = vst [vmem:[%s3271_s28 + $0x198] sm:$0xff] %v2227_v52  ;;  %v2197_v37 = vadd.f32 %v1608_v34, %v3260_v26  ;;  %v2229_v17 = vadd.f32 %v1834_v35, %v3263_v39 }
 0x1fc   : > { %1899 = vst [vmem:[%s3271_s28 + $0x1a0] sm:$0xff] %v2196_v31  ;;  %1901 = vst [vmem:[%s3271_s28 + $0x1b0] sm:$0xff] %v2228_v33 }
 0x1fd   : > { %1900 = vst [vmem:[%s3271_s28 + $0x1a8] sm:$0xff] %v2197_v37  ;;  %1902 = vst [vmem:[%s3271_s28 + $0x1b8] sm:$0xff] %v2229_v17 }
 0x1ff   : > { %v1612_v38 = vpop.f32.mrb[28].mxu0  ;;  %v1838_v40 = vpop.f32.mrb[28].mxu1 }
 0x200   : > { %v2198_v41 = vadd.f32 %v1612_v38, %v3254_v20  ;;  %v2230_v45 = vadd.f32 %v1838_v40, %v3257_v57  ;;  %v1614_v13 = vpop.f32.mrb[29].mxu0  ;;  %v1840_v46 = vpop.f32.mrb[29].mxu1 }
 0x201   : > { %v2199_v54 = vadd.f32 %v1614_v13, %v3260_v26  ;;  %v2231_v0 = vadd.f32 %v1840_v46, %v3263_v39  ;;  %v1616_v2 = vpop.f32.mrb[30].mxu0  ;;  %v1842_v7 = vpop.f32.mrb[30].mxu1 }
 0x202   : > { %1903 = vst [vmem:[%s3271_s28 + $0x1c0] sm:$0xff] %v2198_v41  ;;  %1905 = vst [vmem:[%s3271_s28 + $0x1d0] sm:$0xff] %v2230_v45  ;;  %v2200_v51 = vadd.f32 %v1616_v2, %v3254_v20  ;;  %v2232_v36 = vadd.f32 %v1842_v7, %v3257_v57  ;;  %v1618_v43 = vpop.f32.mrb[31].mxu0  ;;  %v1844_v48 = vpop.f32.mrb[31].mxu1 }
 0x203   : > { %1904 = vst [vmem:[%s3271_s28 + $0x1c8] sm:$0xff] %v2199_v54  ;;  %1906 = vst [vmem:[%s3271_s28 + $0x1d8] sm:$0xff] %v2231_v0  ;;  %v2201_v53 = vadd.f32 %v1618_v43, %v3260_v26  ;;  %v2233_v20 = vadd.f32 %v1844_v48, %v3263_v39 }
 0x204   : > { %1907 = vst [vmem:[%s3271_s28 + $0x1e0] sm:$0xff] %v2200_v51  ;;  %1909 = vst [vmem:[%s3271_s28 + $0x1f0] sm:$0xff] %v2232_v36 }
 0x205   : > { %1908 = vst [vmem:[%s3271_s28 + $0x1e8] sm:$0xff] %v2201_v53  ;;  %1910 = vst [vmem:[%s3271_s28 + $0x1f8] sm:$0xff] %v2233_v20 }
 0x206   : > { %2662 = shalt.err (!%p2659_p6)
}
 0x207   : > { %s2663_s13 = scalar_lea.hbm %s3394_s14, 8192  ;;  %s2667_s1 = scalar_lea.hbm %s3453_s5, 16384 }
 0x208   : > { %p2664_p12 = scmp.ne.s32.totalorder %s3394_s14, %s2663_s13  ;;  %p2668_p11 = scmp.lt.u32.totalorder %s3394_s14, %s3453_s5 }
 0x209   : > { %p2669_p7 = scmp.lt.u32.totalorder %s2667_s1, %s2663_s13  ;;  %p2671_p8 = scmp.lt.u32.totalorder %s2663_s13, %s3394_s14 }
 0x20a   : > { %p2665_p13 = pnand %p2664_p12, %p3475_p4 }
 0x20b   : > { %p2670_p3 = por %p2669_p7, %p2668_p11 }
 0x20c   : > { %p2666_p1 = pneg %p2665_p13 }
 0x20d   : > { %p2672_p5 = por %p2671_p8, %p2670_p3 }
 0x20f   : > { %p2673_p10 = pnand %p2672_p5, %p2666_p1 }
 0x211   : > { %2676 = shalt.err (!%p2673_p10)
}
 0x212   : > { %s2729_s11 = smov 512   ;;  %s2730_s28 = smov 32  }
 0x213   : > { %2308 = dma.vmem_to_hbm [thread:$0]  (%p3475_p4), %s3396_s15, 8192, %s3394_s14, %s1912_s17, %s2729_s11, %s2729_s11, %s2730_s28  }
 0x214 PF: > { %s1941_s10 = sand.u32 1, %s2707_s18   ;;  %p3476_p2 = scmp.ne.s32.totalorder %s3464_s6, 0 }
 0x215   : > { %p3477_p0 = scmp.ge.s32.totalorder %s2719_s21, 2  ;;  %s1942_s22 = scalar_lea.sflag [#allocation4], %s1941_s10 }
 0x217   : > { %p2322_p9 = pnand %p3477_p0, %p3476_p2 }
 0x219   : > { %2702 = dma.done.wait (!%p2322_p9), %s1942_s22, 8192  }
 0x21a   : > { %2704 = vsyncadd (!%p2322_p9), %s1942_s22, 4294959104  ;;  %s3478_s16 = sld [smem:[#allocation12_spill]]  ;;  %p19_p6 = scmp.ge.s32.totalorder %s2786_s24, 4  }
 0x21b   : > { %s3479_s18 = smov %s2711_s19  ;;  %s3480_s19 = smov %s2715_s20 }
 0x21c   : > { %s3482_s21 = smov %s2786_s24  ;;  %21 = sbr.rel (!%p19_p6) target bundleno = 8 (0x8), region = 93 }
 0x220   : > { %s3481_s20 = smov %s3478_s16 }
 0x223   :  { %1947 = vsyncpa [#allocation3], 1 }
 0x224   :  { %1949 = vsyncpa [#allocation3 + $0x1], 1 }
 0x225   :  { %1950 = vsyncpa [#allocation6], 1 }
 0x226   :  { %1951 = vsyncpa [#allocation4], 1 }
 0x227   :  { %1953 = vsyncpa [#allocation4 + $0x1], 1 }

</bundles_post_ra>
